<compile_context>
chip_gen: v6e
topology: v6e:2x2x1
jax: 0.10.0
libtpu: 0.0.40
codegen_flags: <defaults>
</compile_context>

<pallas_src>
import jax
import jax.numpy as jnp
from jax.experimental import pallas as pl
from jax.experimental.pallas import tpu as pltpu


def _elu(x):
    return jnp.where(x > 0, x, jnp.exp(jnp.minimum(x, 0.0)) - 1.0)


# ---------------------------------------------------------------------------
# Fused kernel: one grid step per graph in the batch.
# ---------------------------------------------------------------------------
def _megat_fused_kernel(x_ref, adj_ref,
                        w1_ref, a1s_ref, a1d_ref,
                        w2_ref, a2s_ref, a2d_ref,
                        fc1w_ref, fc1b_ref, fc2w_ref, fc2b_ref,
                        fc3w_ref, fc3b_ref, fc4w_ref, fc4b_ref,
                        out_ref):
    x = x_ref[0]                                   # [N, Fin]
    adj = adj_ref[0]                               # [P, N, N]
    P = adj.shape[0]
    N = x.shape[0]

    def conv(xi, ei, w, a_src, a_dst):
        # xi: [N, Fi]; ei: [P, N, N] non-negative edge weights.
        h = jnp.dot(xi, w, preferred_element_type=jnp.float32)      # [N, Fo]
        fo = h.shape[-1]
        src = jnp.sum(h * a_src, axis=-1, keepdims=True)            # [N, 1]
        dst = jnp.sum(h * a_dst, axis=-1, keepdims=True)            # [N, 1]
        logits = src + jnp.transpose(dst)                           # [N, N]
        logits = jnp.where(logits > 0, logits, 0.2 * logits)        # leaky_relu
        e = jnp.exp(logits - jnp.max(logits))                       # [N, N] <= 1
        wgt = ei * e[None, :, :]                                    # [P, N, N]
        denom = jnp.sum(wgt, axis=-1, keepdims=True)                # [P, N, 1]
        alpha = wgt / jnp.maximum(denom, 1e-16)                     # [P, N, N]
        # Batched aggregation: concat_p(alpha_p @ h) with fused ELU.
        hb = jnp.broadcast_to(h, (P, N, fo))
        agg = jnp.einsum('pij,pjf->pif', alpha, hb,
                         preferred_element_type=jnp.float32)        # [P, N, Fo]
        xo = _elu(jnp.concatenate([agg[p] for p in range(P)], axis=-1))
        return xo, alpha                                            # [N, P*Fo]

    # conv1 -> e1 stays resident in VMEM, directly feeds conv2.
    x1, e1 = conv(x, adj, w1_ref[...], a1s_ref[...], a1d_ref[...])  # [N, 16P]
    x2, _ = conv(x1, e1, w2_ref[...], a2s_ref[...], a2d_ref[...])   # [N, 4P]

    # MLP head.  fc1 weight is pre-reshaped to [N, 4P, 20] so that
    # x.view(B,-1) @ W_fc1 == sum_n x2[n] @ W_fc1[n]  (no in-kernel reshape).
    part = jnp.einsum('nif,nfk->nik', x2[:, None, :], fc1w_ref[...],
                      preferred_element_type=jnp.float32)           # [N, 1, 20]
    h = _elu(jnp.sum(part, axis=0) + fc1b_ref[...])                 # [1, 20]
    h = _elu(jnp.dot(h, fc2w_ref[...],
                     preferred_element_type=jnp.float32) + fc2b_ref[...])
    h = _elu(jnp.dot(h, fc3w_ref[...],
                     preferred_element_type=jnp.float32) + fc3b_ref[...])
    out_ref[0] = jnp.dot(h, fc4w_ref[...],
                         preferred_element_type=jnp.float32) + fc4b_ref[...]


# ---------------------------------------------------------------------------
# Full MEGAT forward (single pallas_call).
# ---------------------------------------------------------------------------
def megat_forward(x, adj, params):
    B, N, Fin = x.shape
    P = adj.shape[1]
    f1_out = params["fc1_w"].shape[1]
    # Host-side (free) reshape so fc1 needs no lane-dim reshape in the kernel.
    fc1_w = params["fc1_w"].reshape(N, 4 * P, f1_out)

    weights = (params["conv1_w"], params["conv1_asrc"], params["conv1_adst"],
               params["conv2_w"], params["conv2_asrc"], params["conv2_adst"],
               fc1_w, params["fc1_b"],
               params["fc2_w"], params["fc2_b"],
               params["fc3_w"], params["fc3_b"],
               params["fc4_w"], params["fc4_b"])

    in_specs = [
        pl.BlockSpec((1, N, Fin), lambda b: (b, 0, 0)),
        pl.BlockSpec((1, P, N, N), lambda b: (b, 0, 0, 0)),
    ]
    for w in weights:
        in_specs.append(pl.BlockSpec(w.shape, lambda b, _n=w.ndim: (0,) * _n))

    # Advisory cost hint for XLA scheduling around the custom call.
    flops = 2 * B * (N * Fin * 16 + P * N * N * 16
                     + N * (16 * P) * 4 + P * N * N * 4
                     + N * (4 * P) * 20 + 20 * 16 + 16 * 20 + 20 * 2)
    transcendentals = B * (2 * N * N + N * 16 * P + N * 4 * P + 56)
    bytes_accessed = 4 * (x.size + adj.size
                          + sum(int(w.size) for w in weights) + B * 2)

    out = pl.pallas_call(
        _megat_fused_kernel,
        grid=(B,),
        in_specs=in_specs,
        out_specs=pl.BlockSpec((1, 1, 2), lambda b: (b, 0, 0)),
        out_shape=jax.ShapeDtypeStruct((B, 1, 2), jnp.float32),
        compiler_params=pltpu.CompilerParams(
            dimension_semantics=("parallel",)),
        cost_estimate=pl.CostEstimate(flops=flops,
                                      transcendentals=transcendentals,
                                      bytes_accessed=bytes_accessed),
    )(x, adj, *weights)

    logits = out[:, 0, :]                      # [B, 2]
    reg = jnp.zeros((1,), jnp.float32)         # torch.tensor([0.])
    return logits, reg


def init_params(key, num_features, num_nodes, edge_attr_dim):
    ks = jax.random.split(key, 14)
    s = 0.1

    def nrm(k, shape):
        return s * jax.random.normal(k, shape, jnp.float32)

    P = edge_attr_dim
    return {
        "conv1_w":    nrm(ks[0], (num_features, 16)),
        "conv1_asrc": nrm(ks[1], (1, 16)),
        "conv1_adst": nrm(ks[2], (1, 16)),
        "conv2_w":    nrm(ks[3], (16 * P, 4)),
        "conv2_asrc": nrm(ks[4], (1, 4)),
        "conv2_adst": nrm(ks[5], (1, 4)),
        "fc1_w": nrm(ks[6], (num_nodes * 4 * P, 20)),
        "fc1_b": nrm(ks[7], (1, 20)),
        "fc2_w": nrm(ks[8], (20, 16)),
        "fc2_b": nrm(ks[9], (1, 16)),
        "fc3_w": nrm(ks[10], (16, 20)),
        "fc3_b": nrm(ks[11], (1, 20)),
        "fc4_w": nrm(ks[12], (20, 2)),
        "fc4_b": nrm(ks[13], (1, 2)),
    }


if __name__ == "__main__":
    B, N, F_IN, P = 2, 16, 8, 3   # graphs, nodes/graph, node feats, edge-attr dim

    key = jax.random.PRNGKey(0)
    k_x, k_v, k_m, k_p = jax.random.split(key, 4)

    x = jax.random.normal(k_x, (B, N, F_IN), jnp.float32)

    # Dense multi-dimensional adjacency (pre-normalized edge_attr) with
    # self-loops so every row has at least one edge.
    vals = jax.random.uniform(k_v, (B, P, N, N), jnp.float32, 0.1, 1.0)
    mask = jax.random.bernoulli(k_m, 0.3, (B, P, N, N))
    eye = jnp.eye(N, dtype=bool)[None, None, :, :]
    adj = jnp.where(mask | eye, vals, 0.0).astype(jnp.float32)

    params = init_params(k_p, F_IN, N, P)

    logits, reg = megat_forward(x, adj, params)
    jax.block_until_ready((logits, reg))
    assert logits.shape == (B, 2) and reg.shape == (1,)
    print("KERNEL_OK")
</pallas_src>

<mosaic_0001>
module attributes {stable_mosaic.version = 11 : i64} {
  func.func @_megat_fused_kernel(%arg0: i32, %arg1: memref<1x16x8xf32, #tpu.memory_space<vmem>>, %arg2: memref<1x3x16x16xf32, #tpu.memory_space<vmem>>, %arg3: memref<8x16xf32, #tpu.memory_space<vmem>>, %arg4: memref<1x16xf32, #tpu.memory_space<vmem>>, %arg5: memref<1x16xf32, #tpu.memory_space<vmem>>, %arg6: memref<48x4xf32, #tpu.memory_space<vmem>>, %arg7: memref<1x4xf32, #tpu.memory_space<vmem>>, %arg8: memref<1x4xf32, #tpu.memory_space<vmem>>, %arg9: memref<16x12x20xf32, #tpu.memory_space<vmem>>, %arg10: memref<1x20xf32, #tpu.memory_space<vmem>>, %arg11: memref<20x16xf32, #tpu.memory_space<vmem>>, %arg12: memref<1x16xf32, #tpu.memory_space<vmem>>, %arg13: memref<16x20xf32, #tpu.memory_space<vmem>>, %arg14: memref<1x20xf32, #tpu.memory_space<vmem>>, %arg15: memref<20x2xf32, #tpu.memory_space<vmem>>, %arg16: memref<1x2xf32, #tpu.memory_space<vmem>>, %arg17: memref<1x1x2xf32, #tpu.memory_space<vmem>>) attributes {dimension_semantics = [#tpu.dimension_semantics<parallel>], iteration_bounds = array<i64: 2>, scalar_prefetch = 0 : i64, scratch_operands = 0 : i64, tpu.core_type = #tpu.core_type<tc>, window_params = [{transform_indices = @transform_0, window_bounds = array<i64: 1, 16, 8>}, {transform_indices = @transform_1, window_bounds = array<i64: 1, 3, 16, 16>}, {pipeline_mode = #tpu.pipeline_mode<synchronous>, transform_indices = @transform_2, window_bounds = array<i64: 8, 16>}, {pipeline_mode = #tpu.pipeline_mode<synchronous>, transform_indices = @transform_3, window_bounds = array<i64: 1, 16>}, {pipeline_mode = #tpu.pipeline_mode<synchronous>, transform_indices = @transform_4, window_bounds = array<i64: 1, 16>}, {pipeline_mode = #tpu.pipeline_mode<synchronous>, transform_indices = @transform_5, window_bounds = array<i64: 48, 4>}, {pipeline_mode = #tpu.pipeline_mode<synchronous>, transform_indices = @transform_6, window_bounds = array<i64: 1, 4>}, {pipeline_mode = #tpu.pipeline_mode<synchronous>, transform_indices = @transform_7, window_bounds = array<i64: 1, 4>}, {pipeline_mode = #tpu.pipeline_mode<synchronous>, transform_indices = @transform_8, window_bounds = array<i64: 16, 12, 20>}, {pipeline_mode = #tpu.pipeline_mode<synchronous>, transform_indices = @transform_9, window_bounds = array<i64: 1, 20>}, {pipeline_mode = #tpu.pipeline_mode<synchronous>, transform_indices = @transform_10, window_bounds = array<i64: 20, 16>}, {pipeline_mode = #tpu.pipeline_mode<synchronous>, transform_indices = @transform_11, window_bounds = array<i64: 1, 16>}, {pipeline_mode = #tpu.pipeline_mode<synchronous>, transform_indices = @transform_12, window_bounds = array<i64: 16, 20>}, {pipeline_mode = #tpu.pipeline_mode<synchronous>, transform_indices = @transform_13, window_bounds = array<i64: 1, 20>}, {pipeline_mode = #tpu.pipeline_mode<synchronous>, transform_indices = @transform_14, window_bounds = array<i64: 20, 2>}, {pipeline_mode = #tpu.pipeline_mode<synchronous>, transform_indices = @transform_15, window_bounds = array<i64: 1, 2>}, {transform_indices = @transform_16, window_bounds = array<i64: 1, 1, 2>}]} {
    %c0 = arith.constant 0 : index
    %c0_0 = arith.constant 0 : index
    %c0_1 = arith.constant 0 : index
    %0 = vector.load %arg1[%c0, %c0_0, %c0_1] : memref<1x16x8xf32, #tpu.memory_space<vmem>>, vector<1x16x8xf32>
    %1 = vector.shape_cast %0 : vector<1x16x8xf32> to vector<16x8xf32>
    %c0_2 = arith.constant 0 : index
    %c0_3 = arith.constant 0 : index
    %c0_4 = arith.constant 0 : index
    %c0_5 = arith.constant 0 : index
    %2 = vector.load %arg2[%c0_2, %c0_3, %c0_4, %c0_5] : memref<1x3x16x16xf32, #tpu.memory_space<vmem>>, vector<1x3x16x16xf32>
    %3 = vector.shape_cast %2 : vector<1x3x16x16xf32> to vector<3x16x16xf32>
    %c0_6 = arith.constant 0 : index
    %c0_7 = arith.constant 0 : index
    %4 = vector.load %arg3[%c0_6, %c0_7] : memref<8x16xf32, #tpu.memory_space<vmem>>, vector<8x16xf32>
    %c0_8 = arith.constant 0 : index
    %c0_9 = arith.constant 0 : index
    %5 = vector.load %arg4[%c0_8, %c0_9] : memref<1x16xf32, #tpu.memory_space<vmem>>, vector<1x16xf32>
    %c0_10 = arith.constant 0 : index
    %c0_11 = arith.constant 0 : index
    %6 = vector.load %arg5[%c0_10, %c0_11] : memref<1x16xf32, #tpu.memory_space<vmem>>, vector<1x16xf32>
    %cst = arith.constant dense<0.000000e+00> : vector<16x16xf32>
    %7 = tpu.matmul %1, %4, %cst {dimension_numbers = #tpu.dot_dimension_numbers<[1], [0], [0], [1], [0, 0, 1, 1], [], []>} : vector<16x8xf32>, vector<8x16xf32>, vector<16x16xf32> -> vector<16x16xf32>
    %8 = vector.broadcast %5 : vector<1x16xf32> to vector<16x16xf32>
    %9 = arith.mulf %7, %8 : vector<16x16xf32>
    %cst_12 = arith.constant dense<0.000000e+00> : vector<16xf32>
    %10 = vector.multi_reduction <add>, %9, %cst_12 [1] : vector<16x16xf32> to vector<16xf32>
    %11 = vector.shape_cast %10 : vector<16xf32> to vector<16x1xf32>
    %12 = vector.broadcast %6 : vector<1x16xf32> to vector<16x16xf32>
    %13 = arith.mulf %7, %12 : vector<16x16xf32>
    %cst_13 = arith.constant dense<0.000000e+00> : vector<16xf32>
    %14 = vector.multi_reduction <add>, %13, %cst_13 [1] : vector<16x16xf32> to vector<16xf32>
    %15 = vector.shape_cast %14 : vector<16xf32> to vector<16x1xf32>
    %16 = tpu.transpose %15, [1, 0] : vector<16x1xf32> -> vector<1x16xf32>
    %17 = vector.broadcast %11 : vector<16x1xf32> to vector<16x16xf32>
    %18 = vector.broadcast %16 : vector<1x16xf32> to vector<16x16xf32>
    %19 = arith.addf %17, %18 : vector<16x16xf32>
    %cst_14 = arith.constant 0.000000e+00 : f32
    %20 = vector.broadcast %cst_14 : f32 to vector<16x16xf32>
    %21 = arith.cmpf ogt, %19, %20 : vector<16x16xf32>
    %cst_15 = arith.constant 2.000000e-01 : f32
    %22 = vector.broadcast %cst_15 : f32 to vector<16x16xf32>
    %23 = arith.mulf %22, %19 : vector<16x16xf32>
    %24 = arith.select %21, %19, %23 : vector<16x16xi1>, vector<16x16xf32>
    %25 = vector.shape_cast %24 : vector<16x16xf32> to vector<1x16x16xf32>
    %cst_16 = arith.constant dense<0xFF800000> : vector<1xf32>
    %26 = vector.multi_reduction <maximumf>, %25, %cst_16 [1, 2] : vector<1x16x16xf32> to vector<1xf32>
    %27 = vector.shape_cast %26 : vector<1xf32> to vector<1x1x1xf32>
    %28 = vector.extract %27[0, 0, 0] : f32 from vector<1x1x1xf32>
    %29 = vector.broadcast %28 : f32 to vector<16x16xf32>
    %30 = arith.subf %24, %29 : vector<16x16xf32>
    %31 = math.exp %30 : vector<16x16xf32>
    %32 = vector.shape_cast %31 : vector<16x16xf32> to vector<1x16x16xf32>
    %33 = vector.broadcast %32 : vector<1x16x16xf32> to vector<3x16x16xf32>
    %34 = arith.mulf %3, %33 : vector<3x16x16xf32>
    %cst_17 = arith.constant dense<0.000000e+00> : vector<3x16xf32>
    %35 = vector.multi_reduction <add>, %34, %cst_17 [2] : vector<3x16x16xf32> to vector<3x16xf32>
    %36 = vector.shape_cast %35 : vector<3x16xf32> to vector<3x16x1xf32>
    %cst_18 = arith.constant 1.000000e-16 : f32
    %37 = vector.broadcast %cst_18 : f32 to vector<3x16x1xf32>
    %38 = arith.maximumf %36, %37 : vector<3x16x1xf32>
    %39 = vector.broadcast %38 : vector<3x16x1xf32> to vector<3x16x16xf32>
    %40 = arith.divf %34, %39 : vector<3x16x16xf32>
    %41 = vector.shape_cast %7 : vector<16x16xf32> to vector<1x16x16xf32>
    %42 = vector.broadcast %41 : vector<1x16x16xf32> to vector<3x16x16xf32>
    "tpu.trace_start"() <{level = 10 : i32, message = "pij,pjf->pif"}> : () -> ()
    %cst_19 = arith.constant dense<0.000000e+00> : vector<3x16x16xf32>
    %43 = tpu.matmul %40, %42, %cst_19 {dimension_numbers = #tpu.dot_dimension_numbers<[2], [1], [1], [2], [0, 0, 0, 1, 1, 2], [0], [0]>} : vector<3x16x16xf32>, vector<3x16x16xf32>, vector<3x16x16xf32> -> vector<3x16x16xf32>
    "tpu.trace_stop"() : () -> ()
    %44 = vector.extract_strided_slice %43 {offsets = [0, 0, 0], sizes = [1, 16, 16], strides = [1, 1, 1]} : vector<3x16x16xf32> to vector<1x16x16xf32>
    %45 = vector.shape_cast %44 : vector<1x16x16xf32> to vector<16x16xf32>
    %46 = vector.extract_strided_slice %43 {offsets = [1, 0, 0], sizes = [1, 16, 16], strides = [1, 1, 1]} : vector<3x16x16xf32> to vector<1x16x16xf32>
    %47 = vector.shape_cast %46 : vector<1x16x16xf32> to vector<16x16xf32>
    %48 = vector.extract_strided_slice %43 {offsets = [2, 0, 0], sizes = [1, 16, 16], strides = [1, 1, 1]} : vector<3x16x16xf32> to vector<1x16x16xf32>
    %49 = vector.shape_cast %48 : vector<1x16x16xf32> to vector<16x16xf32>
    %50 = tpu.concatenate %45, %47, %49 in 1 : vector<16x16xf32>, vector<16x16xf32>, vector<16x16xf32> -> vector<16x48xf32>
    %cst_20 = arith.constant 0.000000e+00 : f32
    %51 = vector.broadcast %cst_20 : f32 to vector<16x48xf32>
    %52 = arith.cmpf ogt, %50, %51 : vector<16x48xf32>
    %cst_21 = arith.constant 0.000000e+00 : f32
    %53 = vector.broadcast %cst_21 : f32 to vector<16x48xf32>
    %54 = arith.minimumf %50, %53 : vector<16x48xf32>
    %55 = math.exp %54 : vector<16x48xf32>
    %cst_22 = arith.constant 1.000000e+00 : f32
    %56 = vector.broadcast %cst_22 : f32 to vector<16x48xf32>
    %57 = arith.subf %55, %56 : vector<16x48xf32>
    %58 = arith.select %52, %50, %57 : vector<16x48xi1>, vector<16x48xf32>
    %c0_23 = arith.constant 0 : index
    %c0_24 = arith.constant 0 : index
    %59 = vector.load %arg6[%c0_23, %c0_24] : memref<48x4xf32, #tpu.memory_space<vmem>>, vector<48x4xf32>
    %c0_25 = arith.constant 0 : index
    %c0_26 = arith.constant 0 : index
    %60 = vector.load %arg7[%c0_25, %c0_26] : memref<1x4xf32, #tpu.memory_space<vmem>>, vector<1x4xf32>
    %c0_27 = arith.constant 0 : index
    %c0_28 = arith.constant 0 : index
    %61 = vector.load %arg8[%c0_27, %c0_28] : memref<1x4xf32, #tpu.memory_space<vmem>>, vector<1x4xf32>
    %cst_29 = arith.constant dense<0.000000e+00> : vector<16x4xf32>
    %62 = tpu.matmul %58, %59, %cst_29 {dimension_numbers = #tpu.dot_dimension_numbers<[1], [0], [0], [1], [0, 0, 1, 1], [], []>} : vector<16x48xf32>, vector<48x4xf32>, vector<16x4xf32> -> vector<16x4xf32>
    %63 = vector.broadcast %60 : vector<1x4xf32> to vector<16x4xf32>
    %64 = arith.mulf %62, %63 : vector<16x4xf32>
    %cst_30 = arith.constant dense<0.000000e+00> : vector<16xf32>
    %65 = vector.multi_reduction <add>, %64, %cst_30 [1] : vector<16x4xf32> to vector<16xf32>
    %66 = vector.shape_cast %65 : vector<16xf32> to vector<16x1xf32>
    %67 = vector.broadcast %61 : vector<1x4xf32> to vector<16x4xf32>
    %68 = arith.mulf %62, %67 : vector<16x4xf32>
    %cst_31 = arith.constant dense<0.000000e+00> : vector<16xf32>
    %69 = vector.multi_reduction <add>, %68, %cst_31 [1] : vector<16x4xf32> to vector<16xf32>
    %70 = vector.shape_cast %69 : vector<16xf32> to vector<16x1xf32>
    %71 = tpu.transpose %70, [1, 0] : vector<16x1xf32> -> vector<1x16xf32>
    %72 = vector.broadcast %66 : vector<16x1xf32> to vector<16x16xf32>
    %73 = vector.broadcast %71 : vector<1x16xf32> to vector<16x16xf32>
    %74 = arith.addf %72, %73 : vector<16x16xf32>
    %cst_32 = arith.constant 0.000000e+00 : f32
    %75 = vector.broadcast %cst_32 : f32 to vector<16x16xf32>
    %76 = arith.cmpf ogt, %74, %75 : vector<16x16xf32>
    %cst_33 = arith.constant 2.000000e-01 : f32
    %77 = vector.broadcast %cst_33 : f32 to vector<16x16xf32>
    %78 = arith.mulf %77, %74 : vector<16x16xf32>
    %79 = arith.select %76, %74, %78 : vector<16x16xi1>, vector<16x16xf32>
    %80 = vector.shape_cast %79 : vector<16x16xf32> to vector<1x16x16xf32>
    %cst_34 = arith.constant dense<0xFF800000> : vector<1xf32>
    %81 = vector.multi_reduction <maximumf>, %80, %cst_34 [1, 2] : vector<1x16x16xf32> to vector<1xf32>
    %82 = vector.shape_cast %81 : vector<1xf32> to vector<1x1x1xf32>
    %83 = vector.extract %82[0, 0, 0] : f32 from vector<1x1x1xf32>
    %84 = vector.broadcast %83 : f32 to vector<16x16xf32>
    %85 = arith.subf %79, %84 : vector<16x16xf32>
    %86 = math.exp %85 : vector<16x16xf32>
    %87 = vector.shape_cast %86 : vector<16x16xf32> to vector<1x16x16xf32>
    %88 = vector.broadcast %87 : vector<1x16x16xf32> to vector<3x16x16xf32>
    %89 = arith.mulf %40, %88 : vector<3x16x16xf32>
    %cst_35 = arith.constant dense<0.000000e+00> : vector<3x16xf32>
    %90 = vector.multi_reduction <add>, %89, %cst_35 [2] : vector<3x16x16xf32> to vector<3x16xf32>
    %91 = vector.shape_cast %90 : vector<3x16xf32> to vector<3x16x1xf32>
    %cst_36 = arith.constant 1.000000e-16 : f32
    %92 = vector.broadcast %cst_36 : f32 to vector<3x16x1xf32>
    %93 = arith.maximumf %91, %92 : vector<3x16x1xf32>
    %94 = vector.broadcast %93 : vector<3x16x1xf32> to vector<3x16x16xf32>
    %95 = arith.divf %89, %94 : vector<3x16x16xf32>
    %96 = vector.shape_cast %62 : vector<16x4xf32> to vector<1x16x4xf32>
    %97 = vector.broadcast %96 : vector<1x16x4xf32> to vector<3x16x4xf32>
    "tpu.trace_start"() <{level = 10 : i32, message = "pij,pjf->pif"}> : () -> ()
    %cst_37 = arith.constant dense<0.000000e+00> : vector<3x16x4xf32>
    %98 = tpu.matmul %95, %97, %cst_37 {dimension_numbers = #tpu.dot_dimension_numbers<[2], [1], [1], [2], [0, 0, 0, 1, 1, 2], [0], [0]>} : vector<3x16x16xf32>, vector<3x16x4xf32>, vector<3x16x4xf32> -> vector<3x16x4xf32>
    "tpu.trace_stop"() : () -> ()
    %99 = vector.extract_strided_slice %98 {offsets = [0, 0, 0], sizes = [1, 16, 4], strides = [1, 1, 1]} : vector<3x16x4xf32> to vector<1x16x4xf32>
    %100 = vector.shape_cast %99 : vector<1x16x4xf32> to vector<16x4xf32>
    %101 = vector.extract_strided_slice %98 {offsets = [1, 0, 0], sizes = [1, 16, 4], strides = [1, 1, 1]} : vector<3x16x4xf32> to vector<1x16x4xf32>
    %102 = vector.shape_cast %101 : vector<1x16x4xf32> to vector<16x4xf32>
    %103 = vector.extract_strided_slice %98 {offsets = [2, 0, 0], sizes = [1, 16, 4], strides = [1, 1, 1]} : vector<3x16x4xf32> to vector<1x16x4xf32>
    %104 = vector.shape_cast %103 : vector<1x16x4xf32> to vector<16x4xf32>
    %105 = tpu.concatenate %100, %102, %104 in 1 : vector<16x4xf32>, vector<16x4xf32>, vector<16x4xf32> -> vector<16x12xf32>
    %cst_38 = arith.constant 0.000000e+00 : f32
    %106 = vector.broadcast %cst_38 : f32 to vector<16x12xf32>
    %107 = arith.cmpf ogt, %105, %106 : vector<16x12xf32>
    %cst_39 = arith.constant 0.000000e+00 : f32
    %108 = vector.broadcast %cst_39 : f32 to vector<16x12xf32>
    %109 = arith.minimumf %105, %108 : vector<16x12xf32>
    %110 = math.exp %109 : vector<16x12xf32>
    %cst_40 = arith.constant 1.000000e+00 : f32
    %111 = vector.broadcast %cst_40 : f32 to vector<16x12xf32>
    %112 = arith.subf %110, %111 : vector<16x12xf32>
    %113 = arith.select %107, %105, %112 : vector<16x12xi1>, vector<16x12xf32>
    %114 = vector.shape_cast %113 : vector<16x12xf32> to vector<16x1x12xf32>
    %c0_41 = arith.constant 0 : index
    %c0_42 = arith.constant 0 : index
    %c0_43 = arith.constant 0 : index
    %115 = vector.load %arg9[%c0_41, %c0_42, %c0_43] : memref<16x12x20xf32, #tpu.memory_space<vmem>>, vector<16x12x20xf32>
    "tpu.trace_start"() <{level = 10 : i32, message = "nif,nfk->nik"}> : () -> ()
    %cst_44 = arith.constant dense<0.000000e+00> : vector<16x1x20xf32>
    %116 = tpu.matmul %114, %115, %cst_44 {dimension_numbers = #tpu.dot_dimension_numbers<[2], [1], [1], [2], [0, 0, 0, 1, 1, 2], [0], [0]>} : vector<16x1x12xf32>, vector<16x12x20xf32>, vector<16x1x20xf32> -> vector<16x1x20xf32>
    "tpu.trace_stop"() : () -> ()
    %cst_45 = arith.constant dense<0.000000e+00> : vector<1x20xf32>
    %117 = vector.multi_reduction <add>, %116, %cst_45 [0] : vector<16x1x20xf32> to vector<1x20xf32>
    %c0_46 = arith.constant 0 : index
    %c0_47 = arith.constant 0 : index
    %118 = vector.load %arg10[%c0_46, %c0_47] : memref<1x20xf32, #tpu.memory_space<vmem>>, vector<1x20xf32>
    %119 = arith.addf %117, %118 : vector<1x20xf32>
    %cst_48 = arith.constant 0.000000e+00 : f32
    %120 = vector.broadcast %cst_48 : f32 to vector<1x20xf32>
    %121 = arith.cmpf ogt, %119, %120 : vector<1x20xf32>
    %cst_49 = arith.constant 0.000000e+00 : f32
    %122 = vector.broadcast %cst_49 : f32 to vector<1x20xf32>
    %123 = arith.minimumf %119, %122 : vector<1x20xf32>
    %124 = math.exp %123 : vector<1x20xf32>
    %cst_50 = arith.constant 1.000000e+00 : f32
    %125 = vector.broadcast %cst_50 : f32 to vector<1x20xf32>
    %126 = arith.subf %124, %125 : vector<1x20xf32>
    %127 = arith.select %121, %119, %126 : vector<1x20xi1>, vector<1x20xf32>
    %c0_51 = arith.constant 0 : index
    %c0_52 = arith.constant 0 : index
    %128 = vector.load %arg11[%c0_51, %c0_52] : memref<20x16xf32, #tpu.memory_space<vmem>>, vector<20x16xf32>
    %cst_53 = arith.constant dense<0.000000e+00> : vector<1x16xf32>
    %129 = tpu.matmul %127, %128, %cst_53 {dimension_numbers = #tpu.dot_dimension_numbers<[1], [0], [0], [1], [0, 0, 1, 1], [], []>} : vector<1x20xf32>, vector<20x16xf32>, vector<1x16xf32> -> vector<1x16xf32>
    %c0_54 = arith.constant 0 : index
    %c0_55 = arith.constant 0 : index
    %130 = vector.load %arg12[%c0_54, %c0_55] : memref<1x16xf32, #tpu.memory_space<vmem>>, vector<1x16xf32>
    %131 = arith.addf %129, %130 : vector<1x16xf32>
    %cst_56 = arith.constant 0.000000e+00 : f32
    %132 = vector.broadcast %cst_56 : f32 to vector<1x16xf32>
    %133 = arith.cmpf ogt, %131, %132 : vector<1x16xf32>
    %cst_57 = arith.constant 0.000000e+00 : f32
    %134 = vector.broadcast %cst_57 : f32 to vector<1x16xf32>
    %135 = arith.minimumf %131, %134 : vector<1x16xf32>
    %136 = math.exp %135 : vector<1x16xf32>
    %cst_58 = arith.constant 1.000000e+00 : f32
    %137 = vector.broadcast %cst_58 : f32 to vector<1x16xf32>
    %138 = arith.subf %136, %137 : vector<1x16xf32>
    %139 = arith.select %133, %131, %138 : vector<1x16xi1>, vector<1x16xf32>
    %c0_59 = arith.constant 0 : index
    %c0_60 = arith.constant 0 : index
    %140 = vector.load %arg13[%c0_59, %c0_60] : memref<16x20xf32, #tpu.memory_space<vmem>>, vector<16x20xf32>
    %cst_61 = arith.constant dense<0.000000e+00> : vector<1x20xf32>
    %141 = tpu.matmul %139, %140, %cst_61 {dimension_numbers = #tpu.dot_dimension_numbers<[1], [0], [0], [1], [0, 0, 1, 1], [], []>} : vector<1x16xf32>, vector<16x20xf32>, vector<1x20xf32> -> vector<1x20xf32>
    %c0_62 = arith.constant 0 : index
    %c0_63 = arith.constant 0 : index
    %142 = vector.load %arg14[%c0_62, %c0_63] : memref<1x20xf32, #tpu.memory_space<vmem>>, vector<1x20xf32>
    %143 = arith.addf %141, %142 : vector<1x20xf32>
    %cst_64 = arith.constant 0.000000e+00 : f32
    %144 = vector.broadcast %cst_64 : f32 to vector<1x20xf32>
    %145 = arith.cmpf ogt, %143, %144 : vector<1x20xf32>
    %cst_65 = arith.constant 0.000000e+00 : f32
    %146 = vector.broadcast %cst_65 : f32 to vector<1x20xf32>
    %147 = arith.minimumf %143, %146 : vector<1x20xf32>
    %148 = math.exp %147 : vector<1x20xf32>
    %cst_66 = arith.constant 1.000000e+00 : f32
    %149 = vector.broadcast %cst_66 : f32 to vector<1x20xf32>
    %150 = arith.subf %148, %149 : vector<1x20xf32>
    %151 = arith.select %145, %143, %150 : vector<1x20xi1>, vector<1x20xf32>
    %c0_67 = arith.constant 0 : index
    %c0_68 = arith.constant 0 : index
    %152 = vector.load %arg15[%c0_67, %c0_68] : memref<20x2xf32, #tpu.memory_space<vmem>>, vector<20x2xf32>
    %cst_69 = arith.constant dense<0.000000e+00> : vector<1x2xf32>
    %153 = tpu.matmul %151, %152, %cst_69 {dimension_numbers = #tpu.dot_dimension_numbers<[1], [0], [0], [1], [0, 0, 1, 1], [], []>} : vector<1x20xf32>, vector<20x2xf32>, vector<1x2xf32> -> vector<1x2xf32>
    %c0_70 = arith.constant 0 : index
    %c0_71 = arith.constant 0 : index
    %154 = vector.load %arg16[%c0_70, %c0_71] : memref<1x2xf32, #tpu.memory_space<vmem>>, vector<1x2xf32>
    %155 = arith.addf %153, %154 : vector<1x2xf32>
    %c0_72 = arith.constant 0 : index
    %c0_73 = arith.constant 0 : index
    %c0_74 = arith.constant 0 : index
    %156 = vector.load %arg17[%c0_72, %c0_73, %c0_74] : memref<1x1x2xf32, #tpu.memory_space<vmem>>, vector<1x1x2xf32>
    %157 = vector.shape_cast %156 : vector<1x1x2xf32> to vector<1x2xf32>
    %158 = vector.shape_cast %155 : vector<1x2xf32> to vector<1x1x2xf32>
    tpu.vector_store %arg17[%c0_72, %c0_73, %c0_74], %158 {strides = array<i32>} : memref<1x1x2xf32, #tpu.memory_space<vmem>>, vector<1x1x2xf32>,
    return
  }
  func.func @transform_0(%arg0: i32) -> (i32, i32, i32) {
    %c0_i32 = arith.constant 0 : i32
    %c0_i32_0 = arith.constant 0 : i32
    %c0_i32_1 = arith.constant 0 : i32
    return %arg0, %c0_i32, %c0_i32_0 : i32, i32, i32
  }
  func.func @transform_1(%arg0: i32) -> (i32, i32, i32, i32) {
    %c0_i32 = arith.constant 0 : i32
    %c0_i32_0 = arith.constant 0 : i32
    %c0_i32_1 = arith.constant 0 : i32
    %c0_i32_2 = arith.constant 0 : i32
    return %arg0, %c0_i32, %c0_i32_0, %c0_i32_1 : i32, i32, i32, i32
  }
  func.func @transform_2(%arg0: i32) -> (i32, i32) {
    %c0_i32 = arith.constant 0 : i32
    %c0_i32_0 = arith.constant 0 : i32
    %c0_i32_1 = arith.constant 0 : i32
    return %c0_i32, %c0_i32_0 : i32, i32
  }
  func.func @transform_3(%arg0: i32) -> (i32, i32) {
    %c0_i32 = arith.constant 0 : i32
    %c0_i32_0 = arith.constant 0 : i32
    %c0_i32_1 = arith.constant 0 : i32
    return %c0_i32, %c0_i32_0 : i32, i32
  }
  func.func @transform_4(%arg0: i32) -> (i32, i32) {
    %c0_i32 = arith.constant 0 : i32
    %c0_i32_0 = arith.constant 0 : i32
    %c0_i32_1 = arith.constant 0 : i32
    return %c0_i32, %c0_i32_0 : i32, i32
  }
  func.func @transform_5(%arg0: i32) -> (i32, i32) {
    %c0_i32 = arith.constant 0 : i32
    %c0_i32_0 = arith.constant 0 : i32
    %c0_i32_1 = arith.constant 0 : i32
    return %c0_i32, %c0_i32_0 : i32, i32
  }
  func.func @transform_6(%arg0: i32) -> (i32, i32) {
    %c0_i32 = arith.constant 0 : i32
    %c0_i32_0 = arith.constant 0 : i32
    %c0_i32_1 = arith.constant 0 : i32
    return %c0_i32, %c0_i32_0 : i32, i32
  }
  func.func @transform_7(%arg0: i32) -> (i32, i32) {
    %c0_i32 = arith.constant 0 : i32
    %c0_i32_0 = arith.constant 0 : i32
    %c0_i32_1 = arith.constant 0 : i32
    return %c0_i32, %c0_i32_0 : i32, i32
  }
  func.func @transform_8(%arg0: i32) -> (i32, i32, i32) {
    %c0_i32 = arith.constant 0 : i32
    %c0_i32_0 = arith.constant 0 : i32
    %c0_i32_1 = arith.constant 0 : i32
    %c0_i32_2 = arith.constant 0 : i32
    return %c0_i32, %c0_i32_0, %c0_i32_1 : i32, i32, i32
  }
  func.func @transform_9(%arg0: i32) -> (i32, i32) {
    %c0_i32 = arith.constant 0 : i32
    %c0_i32_0 = arith.constant 0 : i32
    %c0_i32_1 = arith.constant 0 : i32
    return %c0_i32, %c0_i32_0 : i32, i32
  }
  func.func @transform_10(%arg0: i32) -> (i32, i32) {
    %c0_i32 = arith.constant 0 : i32
    %c0_i32_0 = arith.constant 0 : i32
    %c0_i32_1 = arith.constant 0 : i32
    return %c0_i32, %c0_i32_0 : i32, i32
  }
  func.func @transform_11(%arg0: i32) -> (i32, i32) {
    %c0_i32 = arith.constant 0 : i32
    %c0_i32_0 = arith.constant 0 : i32
    %c0_i32_1 = arith.constant 0 : i32
    return %c0_i32, %c0_i32_0 : i32, i32
  }
  func.func @transform_12(%arg0: i32) -> (i32, i32) {
    %c0_i32 = arith.constant 0 : i32
    %c0_i32_0 = arith.constant 0 : i32
    %c0_i32_1 = arith.constant 0 : i32
    return %c0_i32, %c0_i32_0 : i32, i32
  }
  func.func @transform_13(%arg0: i32) -> (i32, i32) {
    %c0_i32 = arith.constant 0 : i32
    %c0_i32_0 = arith.constant 0 : i32
    %c0_i32_1 = arith.constant 0 : i32
    return %c0_i32, %c0_i32_0 : i32, i32
  }
  func.func @transform_14(%arg0: i32) -> (i32, i32) {
    %c0_i32 = arith.constant 0 : i32
    %c0_i32_0 = arith.constant 0 : i32
    %c0_i32_1 = arith.constant 0 : i32
    return %c0_i32, %c0_i32_0 : i32, i32
  }
  func.func @transform_15(%arg0: i32) -> (i32, i32) {
    %c0_i32 = arith.constant 0 : i32
    %c0_i32_0 = arith.constant 0 : i32
    %c0_i32_1 = arith.constant 0 : i32
    return %c0_i32, %c0_i32_0 : i32, i32
  }
  func.func @transform_16(%arg0: i32) -> (i32, i32, i32) {
    %c0_i32 = arith.constant 0 : i32
    %c0_i32_0 = arith.constant 0 : i32
    %c0_i32_1 = arith.constant 0 : i32
    return %arg0, %c0_i32, %c0_i32_0 : i32, i32, i32
  }
}

</mosaic_0001>

<bundles_post_ra>
// kernel: tpu_custom_call.1
= control target key start
LH: loop header
LB: loop body
LE: loop exit
PB: predicated region body
PF: predicated region fallthrough
CT: control target
= control target key end

     0   :  { %s4397_s0 = inlined_call_operand.vmem [shape: f32[2,16,8], index: 0, kind: input, shape index: {}]   ;;  %s4398_s1 = inlined_call_operand.vmem [shape: f32[2,3,16,16], index: 1, kind: input, shape index: {}]   ;;  %s4399_s2 = inlined_call_operand.vmem [shape: f32[8,16], index: 2, kind: input, shape index: {}]   ;;  %s4400_s3 = inlined_call_operand.vmem [shape: f32[1,16], index: 3, kind: input, shape index: {}]   ;;  %s4401_s4 = inlined_call_operand.vmem [shape: f32[1,16], index: 4, kind: input, shape index: {}]   ;;  %s4402_s5 = inlined_call_operand.vmem [shape: f32[48,4], index: 5, kind: input, shape index: {}]   ;;  %s4403_s6 = inlined_call_operand.vmem [shape: f32[1,4], index: 6, kind: input, shape index: {}]   ;;  %s4404_s7 = inlined_call_operand.vmem [shape: f32[1,4], index: 7, kind: input, shape index: {}]   ;;  %s4405_s8 = inlined_call_operand.vmem [shape: f32[16,12,20], index: 8, kind: input, shape index: {}]   ;;  %s4406_s9 = inlined_call_operand.vmem [shape: f32[1,20], index: 9, kind: input, shape index: {}]   ;;  %s4407_s10 = inlined_call_operand.vmem [shape: f32[20,16], index: 10, kind: input, shape index: {}]   ;;  %s4408_s11 = inlined_call_operand.vmem [shape: f32[1,16], index: 11, kind: input, shape index: {}]   ;;  %s4409_s12 = inlined_call_operand.vmem [shape: f32[16,20], index: 12, kind: input, shape index: {}]   ;;  %s4410_s13 = inlined_call_operand.vmem [shape: f32[1,20], index: 13, kind: input, shape index: {}]   ;;  %s4411_s14 = inlined_call_operand.vmem [shape: f32[20,2], index: 14, kind: input, shape index: {}]   ;;  %s4412_s15 = inlined_call_operand.vmem [shape: f32[1,2], index: 15, kind: input, shape index: {}]   ;;  %s4413_s16 = inlined_call_operand.hbm [shape: f32[2,1,2], index: 16, kind: output, shape index: {}]  }
   0x1   :  { %4415 = sst [smem:[#allocation7_spill]] %s4397_s0 }
   0x2   :  { %4416 = sst [smem:[#allocation8_spill]] %s4398_s1 }
   0x3   :  { %4417 = sst [smem:[#allocation9_spill]] %s4399_s2 }
   0x4   :  { %4418 = sst [smem:[#allocation10_spill]] %s4400_s3 }
   0x5   :  { %21 = vsyncpa [#allocation3], 0 }
   0x6   :  { %23 = vsyncpa [#allocation3 + $0x1], 0  ;;  %s3866_s21 = smov 0   ;;  %s3868_s22 = smov 0  }
   0x7   :  { %s3870_s23 = smov 0   ;;  %s3872_s24 = smov 0  }
   0x8 LB: > { %4419 = sst [smem:[#allocation5_spill]] %s3767_s23  ;;  %s3887_s25 = sadd.s32 4294967295, %s3771_s24   ;;  %s3771_s24 = sphi %s3872_s24, %s4432_s24   ;;  %s3767_s23 = sphi %s3870_s23, %s4431_s23   ;;  %s3763_s22 = sphi %s3868_s22, %s4430_s22   ;;  %s3759_s21 = sphi %s3866_s21, %s4429_s21  }
   0x9   : > { %s3246_s26 = sadd.s32 4294967294, %s3771_s24   ;;  %s3891_s27 = sadd.s32 1, %s3771_s24  }
   0xa   : > { %s382_s28 = sadd.s32 1, %s3767_s23  ;;  %s379_s29 = ssub.s32 %s3771_s24, %s3891_s27 }
   0xb   : > { %p392_p0 = scmp.ne.s32.totalorder %s3767_s23, %s3763_s22  ;;  %p380_p1 = scmp.eq.s32.totalorder %s379_s29, 0 }
   0xc   : > { %p393_p2 = scmp.eq.s32.totalorder %s3887_s25, 1  ;;  %p398_p3 = scmp.ne.s32.totalorder %s3763_s22, %s3759_s21 }
   0xd   : > { %p399_p4 = scmp.eq.s32.totalorder %s3246_s26, 1  ;;  %p3249_p7 = scmp.ge.s32.totalorder %s3771_s24, 1 }
   0xe   : > { %s3902_s30 = scalar_select %p380_p1, %s3767_s23, %s382_s28  }
   0xf   : > { %p3904_p5 = por %p393_p2, %p392_p0  ;;  %p3908_p6 = por %p399_p4, %p398_p3 }
  0x10   : > { %4420 = sst [smem:[#allocation6_spill]] %s3902_s30  ;;  %p475_p8 = scmp.lt.s32.totalorder %s3771_s24, 3 }
  0x12   : > { %p476_p9 = pnand %p3249_p7, %p475_p8 }
  0x13   : > { %s4423_s2 = sld [smem:[#allocation9_spill]] (!%p476_p9)  ;;  %p529_p10 = scmp.lt.s32.totalorder (!%p476_p9), %s3887_s25, 1 }
  0x14   : > { %479 = sbr.rel (%p476_p9) target bundleno = 3339 (0xd0b), region = 84  ;;  %s4424_s30 = sld [smem:[#allocation7_spill]] (!%p476_p9) }
  0x15   : > { %s4425_s3 = sld [smem:[#allocation10_spill]] (!%p476_p9)  ;;  %s3776_s19 = smov (!%p476_p9), 8  }
  0x16   : > { %s4426_s1 = sld [smem:[#allocation8_spill]] (!%p476_p9) }
  0x19   : > { %v547_v0 = vld [vmem:[%s4423_s2] sm:$0xff]  ;;  %s3919_s20 = scalar_select %p529_p10, %s3887_s25, 1  ;;  %vm550_vm0 = vcmask 64512   ;;  %vm640_vm1 = vcmask 130048   ;;  %v693_v17 = vlaneseq  ;;  %vm1027_vm4 = vcmask 261120  }
  0x1a   : > { %3415 = vmatprep.subr.mxu1 %v547_v0  ;;  %v3256_v5 = vld [vmem:[%s4401_s4] ss:$0 sm:$0xff]  ;;  %vm1050_vm5 = vcmask 392192   ;;  %vm1140_vm8 = vcmask 31744   ;;  %vm1676_vm11 = vcmask 1043456   ;;  %vm3778_vm12 = vmmov 0  }
  0x1b   : > { %3416 = vmatpush3.msra.mxu1 %v547_v0  ;;  %s3320_s26 = sshll.u32 %s3919_s20, 4  ;;  %v3255_v6 = vld [vmem:[%s4425_s3] ss:$0 sm:$0xff]  ;;  %v3954_v18 = vshrl.u32 %v693_v17, 7  ;;  %s3614_s28 = smul.u32 48, %s3919_s20  ;;  %vm1673_vm14 = vcmask 97280  }
  0x1c   : > { %s533_s23 = scalar_lea.vmem %s4424_s30, %s3320_s26  ;;  %s3773_s20 = smov 16  }
  0x1d   : > { %v539_v1 = vld [vmem:[%s533_s23] sm:$0xff]  ;;  %v540_v2 = vld [vmem:[%s533_s23 + $0x8] sm:$0xff]  ;;  %v695_v20 = vsub.s32 0, %v3954_v18  ;;  %s538_s30 = scalar_lea.vmem %s4426_s1, %s3614_s28  ;;  %s3774_s23 = smov 32  }
  0x1e   : > { %3417 = vmatprep.mubr.msk.f32.mxu1 %vm550_vm0, %v539_v1  ;;  %v541_v45 = vld [vmem:[%s538_s30] sm:$0xff]  ;;  %v542_v47 = vld [vmem:[%s538_s30 + $0x8] sm:$0xff]  ;;  %v543_v52 = vld [vmem:[%s538_s30 + $0x10] sm:$0xff] }
  0x1f   : > { %3418 = vmatmul.mubr.msk.f32.vlgmr.msra.gmra.mxu1 %vm550_vm0, %v540_v2  ;;  %v544_v55 = vld [vmem:[%s538_s30 + $0x18] sm:$0xff]  ;;  %v545_v58 = vld [vmem:[%s538_s30 + $0x20] sm:$0xff]  ;;  %v546_v61 = vld [vmem:[%s538_s30 + $0x28] sm:$0xff]  ;;  %s527_s30 = sand.u32 1, %s3763_s22  }
  0x20   : > { %s3167_s2 = scalar_lea.sflag [#allocation3], %s527_s30 }
  0xdf   : > { %v3927_v3 = vpop.f32.mrf.mxu1 }
  0xe0   : > { %3420 = vmatprep.subr.mxu1 %v3927_v3  ;;  %3427 = vmatprep.subr.mxu0 %v3927_v3  ;;  %v654_v11 = vmul.f32 %v3927_v3, %v3256_v5  ;;  %v639_v12 = vmul.f32 %v3927_v3, %v3255_v6 }
  0xe1   : > { %v3931_v4 = vpop.f32.mrf.mxu1  ;;  %3421 = vmatpush3.msra.mxu1 %v3927_v3  ;;  %3428 = vmatpush3.msra.mxu0 %v3927_v3 }
  0xe2   : > { %3422 = vmatprep.subr.mxu1 %v3931_v4  ;;  %3429 = vmatprep.subr.mxu0 %v3931_v4  ;;  %v653_v7 = vmul.f32 %v3256_v5, %v3931_v4  ;;  %v638_v8 = vmul.f32 %v3255_v6, %v3931_v4  ;;  %v658_v13 = vsel %vm640_vm1, %v654_v11, 0.0  ;;  %v644_v14 = vsel %vm640_vm1, %v639_v12, 0.0 }
  0xe3   : > { %3423 = vmatpush3.msra.mxu1 %v3931_v4  ;;  %3430 = vmatpush3.msra.mxu0 %v3931_v4 }
  0xe4   : > { %3434 = vmatprep.subr.mxu1 %v3927_v3  ;;  %v655_v9 = vsel %vm640_vm1, %v653_v7, 0.0  ;;  %v641_v10 = vsel %vm640_vm1, %v638_v8, 0.0 }
  0xe5   : > { %656 = vadd.xlane.f32.xlu0 %v655_v9  ;;  %642 = vadd.xlane.f32.xlu1 %v641_v10 }
  0xe9   : > { %659 = vadd.xlane.f32.xlu0 %v658_v13  ;;  %645 = vadd.xlane.f32.xlu1 %v644_v14 }
 0x16e   : > { %v657_v15 = vpop.xlane.xlu0 %656  ;;  %v643_v19 = vpop.xlane.xlu1 %642 }
 0x16f   : > { %661 = vxpose.xlu0.b32.start [1/2] (short) (narrow) %v657_v15, 8 }
 0x172   : > { %v660_v16 = vpop.xlane.xlu0 %659  ;;  %v646_v23 = vpop.xlane.xlu1 %645 }
 0x173   : > { %662 = vxpose.xlu0.b32.end [2/2] (short) (narrow) %v660_v16, 8 }
 0x1eb   : > { %v677_v21 = vpop.trf.xlu0 }
 0x1ec   : > { %v696_v22 = vrot.slane %v677_v21, %v695_v20 }
 0x1ee   : > { %v697_v24 = vadd.f32 %v696_v22, %v643_v19  ;;  %v698_v25 = vadd.f32 %v696_v22, %v646_v23 }
 0x1f0   : > { %v701_v26 = vmul.f32 0.2, %v697_v24  ;;  %v702_v27 = vmul.f32 0.2, %v698_v25  ;;  %vm699_vm2 = vcmp.gt.f32.partialorder %v697_v24, 0.0  ;;  %vm700_vm3 = vcmp.gt.f32.partialorder %v698_v25, 0.0 }
 0x1f2   : > { %v703_v28 = vsel %vm699_vm2, %v697_v24, %v701_v26  ;;  %v704_v29 = vsel %vm700_vm3, %v698_v25, %v702_v27  ;;  %vm2919_vm2 = vcmask 162816  }
 0x1f3   : > { %v705_v30 = vsel %vm640_vm1, %v703_v28, -inf  ;;  %v706_v31 = vsel %vm640_vm1, %v704_v29, -inf }
 0x1f4   : > { %v707_v32 = vmax.f32 %v705_v30, %v706_v31 }
 0x1f6   : > { %708 = vmax.xlane.f32.xlu1 %v707_v32  ;;  %v1047_v32 = vld [vmem:[%s4402_s5 + $0x28] sm:$0xff] }
 0x1f7   : > { %3441 = vmatprep.subr.mxu0 %v1047_v32 }
 0x27f   : > { %v709_v33 = vpop.xlane.xlu1 %708 }
 0x280   : > { %v710_v34 = vrot.slane %v709_v33, 4 }
 0x282   : > { %v711_v35 = vmax.f32 %v709_v33, %v710_v34  ;;  %v1046_v34 = vld [vmem:[%s4402_s5 + $0x20] sm:$0xff] }
 0x284   : > { %v712_v36 = vrot.slane %v711_v35, 2 }
 0x286   : > { %v713_v37 = vmax.f32 %v711_v35, %v712_v36  ;;  %v1045_v35 = vld [vmem:[%s4402_s5 + $0x18] sm:$0xff]  ;;  %v1044_v36 = vld [vmem:[%s4402_s5 + $0x10] sm:$0xff] }
 0x288   : > { %v714_v38 = vrot.slane %v713_v37, 1 }
 0x28a   : > { %v715_v39 = vmax.f32 %v713_v37, %v714_v38  ;;  %v1043_v37 = vld [vmem:[%s4402_s5 + $0x8] sm:$0xff]  ;;  %v1042_v38 = vld [vmem:[%s4402_s5] sm:$0xff] }
 0x28c   : > { %3615 = vpush %v715_v39 }
 0x2bd   : > { %s3616_s26 = spop %3615 }
 0x2be   : > { %v717_v40 = vstv %s3616_s26  ;;  %s528_s26 = scalar_lea.vmem [#allocation2], %s527_s30 }
 0x2bf   : > { %v718_v41 = vsub.f32 %v703_v28, %v717_v40  ;;  %v719_v42 = vsub.f32 %v704_v29, %v717_v40  ;;  %s3179_s28 = sshll.u32 %s528_s26, 4  ;;  %s3180_s28 = int_to_ptr.vmem [resolvable:$true] %s3179_s28 }
 0x2c0   : > { %s3711_s3 = scalar_lea.vmem %s3180_s28, 16 }
 0x2c1   : > { %v720_v43 = vmul.f32 1.442695, %v718_v41  ;;  %v722_v44 = vmul.f32 1.442695, %v719_v42  ;;  %p3712_p11 = scmp.ne.s32.totalorder %s3180_s28, %s3711_s3 }
 0x2c3   : > { %3665 = vpow2.f32 %v720_v43  ;;  %p3713_p12 = pnand %p3712_p11, %p3904_p5 }
 0x2c4   : > { %3667 = vpow2.f32 %v722_v44 }
 0x2c5   : > { %p3714_p13 = pneg %p3713_p12 }
 0x2d0   : > { %v3666_v46 = vpop.eup %3665 }
 0x2d1   : > { %v3668_v48 = vpop.eup %3667  ;;  %v724_v49 = vmul.f32 %v3666_v46, %v541_v45  ;;  %v726_v54 = vmul.f32 %v3666_v46, %v543_v52  ;;  %v728_v60 = vmul.f32 %v3666_v46, %v545_v58 }
 0x2d2   : > { %v725_v51 = vmul.f32 %v3668_v48, %v542_v47  ;;  %v727_v57 = vmul.f32 %v3668_v48, %v544_v55  ;;  %v729_v63 = vmul.f32 %v3668_v48, %v546_v61 }
 0x2d3   : > { %v730_v50 = vsel %vm640_vm1, %v724_v49, 0.0  ;;  %v736_v56 = vsel %vm640_vm1, %v726_v54, 0.0  ;;  %v742_v62 = vsel %vm640_vm1, %v728_v60, 0.0 }
 0x2d4   : > { %731 = vadd.xlane.f32.xlu1 %v730_v50  ;;  %v733_v53 = vsel %vm640_vm1, %v725_v51, 0.0  ;;  %v739_v59 = vsel %vm640_vm1, %v727_v57, 0.0  ;;  %v745_v0 = vsel %vm640_vm1, %v729_v63, 0.0 }
 0x2d8   : > { %734 = vadd.xlane.f32.xlu1 %v733_v53 }
 0x2dc   : > { %737 = vadd.xlane.f32.xlu1 %v736_v56 }
 0x2e0   : > { %740 = vadd.xlane.f32.xlu1 %v739_v59  ;;  %v3268_v59 = vld [vmem:[%s4404_s7] ss:$0 sm:$0xff] }
 0x2e4   : > { %743 = vadd.xlane.f32.xlu1 %v742_v62 }
 0x2e8   : > { %746 = vadd.xlane.f32.xlu1 %v745_v0 }
 0x35d   : > { %v732_v1 = vpop.xlane.xlu1 %731 }
 0x35e   : > { %v748_v2 = vmax.f32 %v732_v1, 1e-16 }
 0x360   : > { %3669 = vrcp.f32 %v748_v2 }
 0x361   : > { %v735_v5 = vpop.xlane.xlu1 %734 }
 0x362   : > { %v749_v6 = vmax.f32 %v735_v5, 1e-16 }
 0x364   : > { %3671 = vrcp.f32 %v749_v6 }
 0x365   : > { %v738_v7 = vpop.xlane.xlu1 %737 }
 0x366   : > { %v750_v8 = vmax.f32 %v738_v7, 1e-16 }
 0x368   : > { %3673 = vrcp.f32 %v750_v8 }
 0x369   : > { %v741_v9 = vpop.xlane.xlu1 %740 }
 0x36a   : > { %v751_v10 = vmax.f32 %v741_v9, 1e-16 }
 0x36c   : > { %3675 = vrcp.f32 %v751_v10 }
 0x36d   : > { %v3670_v11 = vpop.eup %3669  ;;  %v744_v12 = vpop.xlane.xlu1 %743 }
 0x36e   : > { %v752_v13 = vmax.f32 %v744_v12, 1e-16  ;;  %v3971_v14 = vmul.f32 %v3670_v11, %v724_v49 }
 0x370   : > { %3677 = vrcp.f32 %v752_v13  ;;  %3424 = vmatprep.mubr.msk.f32.mxu1 %vm640_vm1, %v3971_v14 }
 0x371   : > { %v3672_v15 = vpop.eup %3671  ;;  %v747_v16 = vpop.xlane.xlu1 %746 }
 0x372   : > { %v753_v17 = vmax.f32 %v747_v16, 1e-16  ;;  %v3975_v19 = vmul.f32 %v3672_v15, %v725_v51 }
 0x374   : > { %3679 = vrcp.f32 %v753_v17  ;;  %3425 = vmatmul.mubr.msk.f32.vlgmr.msra.gmra.mxu1 %vm640_vm1, %v3975_v19 }
 0x375   : > { %v3674_v21 = vpop.eup %3673  ;;  %3435 = vmatpush3.msra.mxu1 %v3927_v3 }
 0x376   : > { %3436 = vmatprep.subr.mxu1 %v3931_v4  ;;  %v3981_v22 = vmul.f32 %v3674_v21, %v726_v54 }
 0x377   : > { %3437 = vmatpush3.msra.mxu1 %v3931_v4 }
 0x378   : > { %3431 = vmatprep.mubr.msk.f32.mxu0 %vm640_vm1, %v3981_v22 }
 0x379   : > { %v3676_v23 = vpop.eup %3675 }
 0x37a   : > { %v3986_v24 = vmul.f32 %v3676_v23, %v727_v57 }
 0x37c   : > { %3432 = vmatmul.mubr.msk.f32.vlgmr.msra.gmra.mxu0 %vm640_vm1, %v3986_v24 }
 0x37d   : > { %v3678_v25 = vpop.eup %3677  ;;  %3442 = vmatpush3.msra.mxu0 %v1047_v32 }
 0x37e   : > { %v3990_v26 = vmul.f32 %v3678_v25, %v728_v60  ;;  %3443 = vmatprep.subr.mxu0 %v1046_v34  ;;  %v3267_v60 = vld [vmem:[%s4403_s6] ss:$0 sm:$0xff] }
 0x37f   : > { %3444 = vmatpush3.msra.mxu0 %v1046_v34 }
 0x380   : > { %3438 = vmatprep.mubr.msk.f32.mxu1 %vm640_vm1, %v3990_v26  ;;  %3445 = vmatprep.subr.mxu0 %v1045_v35 }
 0x381   : > { %v3680_v3 = vpop.eup %3679  ;;  %3446 = vmatpush3.msra.mxu0 %v1045_v35 }
 0x382   : > { %v3994_v27 = vmul.f32 %v3680_v3, %v729_v63  ;;  %3447 = vmatprep.subr.mxu0 %v1044_v36 }
 0x383   : > { %3448 = vmatpush3.msra.mxu0 %v1044_v36 }
 0x384   : > { %3439 = vmatmul.mubr.msk.f32.vlgmr.msra.gmra.mxu1 %vm640_vm1, %v3994_v27  ;;  %3449 = vmatprep.subr.mxu0 %v1043_v37 }
 0x385   : > { %3450 = vmatpush3.msra.mxu0 %v1043_v37 }
 0x386   : > { %3451 = vmatprep.subr.mxu0 %v1042_v38 }
 0x387   : > { %3452 = vmatpush3.msra.mxu0 %v1042_v38 }
 0x434   : > { %v3426_v28 = vpop.f32.mrf.mxu1 }
 0x436   : > { %v838_v30 = vpop.f32.mrf.mxu1 }
 0x43c   : > { %v3433_v4 = vpop.f32.mrf.mxu0 }
 0x43d   : > { %1013 = vrot.lane.b32.xlu1 %v3433_v4, %s3773_s20 }
 0x43e   : > { %v919_v29 = vpop.f32.mrf.mxu0 }
 0x441   : > { %1011 = vrot.lane.b32.xlu1 %v919_v29, %s3773_s20 }
 0x444   : > { %v3440_v31 = vpop.f32.mrf.mxu1 }
 0x445   : > { %1021 = vrot.lane.b32.xlu1 %v3440_v31, %s3774_s23 }
 0x446   : > { %v1000_v33 = vpop.f32.mrf.mxu1 }
 0x447   : > { %1019 = vrot.lane.b32.xlu0 %v1000_v33, %s3774_s23  ;;  %s3775_s23 = smov 4  }
 0x4af   : > { %v1014_v39 = vpop.permute.xlu1 %1013 }
 0x4b0   : > { %v1026_v41 = vsel %vm640_vm1, %v3426_v28, %v1014_v39 }
 0x4b3   : > { %v1012_v40 = vpop.permute.xlu1 %1011 }
 0x4b4   : > { %v1025_v44 = vsel %vm640_vm1, %v838_v30, %v1012_v40 }
 0x4b7   : > { %v1022_v42 = vpop.permute.xlu1 %1021 }
 0x4b8   : > { %v1029_v43 = vsel %vm1027_vm4, %v1026_v41, %v1022_v42 }
 0x4b9   : > { %v1033_v45 = vmin.f32 %v1029_v43, 0.0  ;;  %v1020_v46 = vpop.permute.xlu0 %1019  ;;  %vm1031_vm7 = vcmp.gt.f32.partialorder %v1029_v43, 0.0 }
 0x4ba   : > { %v1028_v47 = vsel %vm1027_vm4, %v1025_v44, %v1020_v46 }
 0x4bb   : > { %v1036_v48 = vmul.f32 1.442695, %v1033_v45  ;;  %v1032_v49 = vmin.f32 %v1028_v47, 0.0  ;;  %vm1030_vm6 = vcmp.gt.f32.partialorder %v1028_v47, 0.0 }
 0x4bd   : > { %3681 = vpow2.f32 %v1036_v48  ;;  %v1034_v50 = vmul.f32 1.442695, %v1032_v49 }
 0x4bf   : > { %3683 = vpow2.f32 %v1034_v50 }
 0x4ca   : > { %v3682_v51 = vpop.eup %3681 }
 0x4cb   : > { %v3264_v53 = vadd.f32 -1.0, %v3682_v51 }
 0x4cc   : > { %v3684_v52 = vpop.eup %3683 }
 0x4cd   : > { %v3263_v54 = vadd.f32 -1.0, %v3684_v52  ;;  %v1041_v56 = vsel %vm1031_vm7, %v1029_v43, %v3264_v53 }
 0x4cf   : > { %v1040_v55 = vsel %vm1030_vm6, %v1028_v47, %v3263_v54 }
 0x4d0   : > { %3453 = vmatprep.mubr.msk.f32.mxu0 %vm1050_vm5, %v1040_v55 }
 0x4d1   : > { %3454 = vmatmul.mubr.msk.f32.vlgmr.msra.gmra.mxu0 %vm1050_vm5, %v1041_v56  ;;  %vm3164_vm5 = vcmask 8192  }
 0x591   : > { %v4018_v57 = vpop.f32.mrf.mxu0 }
 0x592   : > { %3456 = vmatprep.subr.mxu1 %v4018_v57  ;;  %v1154_v1 = vmul.f32 %v4018_v57, %v3268_v59  ;;  %v1139_v5 = vmul.f32 %v4018_v57, %v3267_v60 }
 0x593   : > { %v4021_v58 = vpop.f32.mrf.mxu0  ;;  %3457 = vmatpush3.msra.mxu1 %v4018_v57 }
 0x594   : > { %3458 = vmatprep.subr.mxu1 %v4021_v58  ;;  %v1153_v61 = vmul.f32 %v3268_v59, %v4021_v58  ;;  %v1138_v62 = vmul.f32 %v3267_v60, %v4021_v58  ;;  %v1158_v2 = vsel %vm1140_vm8, %v1154_v1, 0.0  ;;  %v1144_v6 = vsel %vm1140_vm8, %v1139_v5, 0.0 }
 0x595   : > { %3459 = vmatpush3.msra.mxu1 %v4021_v58 }
 0x596   : > { %3463 = vmatprep.subr.mxu1 %v4018_v57  ;;  %v1155_v63 = vsel %vm1140_vm8, %v1153_v61, 0.0  ;;  %v1141_v0 = vsel %vm1140_vm8, %v1138_v62, 0.0 }
 0x597   : > { %1156 = vadd.xlane.f32.xlu1 %v1155_v63  ;;  %1142 = vadd.xlane.f32.xlu0 %v1141_v0 }
 0x59b   : > { %1159 = vadd.xlane.f32.xlu1 %v1158_v2 }
 0x59f   : > { %1145 = vadd.xlane.f32.xlu1 %v1144_v6 }
 0x620   : > { %v1157_v7 = vpop.xlane.xlu1 %1156  ;;  %v1143_v12 = vpop.xlane.xlu0 %1142 }
 0x621   : > { %1161 = vxpose.xlu1.b32.start [1/2] (short) (narrow) %v1157_v7, 8 }
 0x624   : > { %v1160_v8 = vpop.xlane.xlu1 %1159 }
 0x625   : > { %1162 = vxpose.xlu1.b32.end [2/2] (short) (narrow) %v1160_v8, 8 }
 0x628   : > { %v1146_v9 = vpop.xlane.xlu1 %1145 }
 0x69d   : > { %v1177_v10 = vpop.trf.xlu1 }
 0x69e   : > { %v1196_v11 = vrot.slane %v1177_v10, %v695_v20 }
 0x6a0   : > { %v1197_v13 = vadd.f32 %v1196_v11, %v1143_v12  ;;  %v1198_v15 = vadd.f32 %v1196_v11, %v1146_v9 }
 0x6a2   : > { %v1201_v16 = vmul.f32 0.2, %v1197_v13  ;;  %v1202_v17 = vmul.f32 0.2, %v1198_v15  ;;  %vm1199_vm9 = vcmp.gt.f32.partialorder %v1197_v13, 0.0  ;;  %vm1200_vm10 = vcmp.gt.f32.partialorder %v1198_v15, 0.0 }
 0x6a4   : > { %v1203_v21 = vsel %vm1199_vm9, %v1197_v13, %v1201_v16  ;;  %v1204_v23 = vsel %vm1200_vm10, %v1198_v15, %v1202_v17  ;;  %v3777_v17 = vmov 0.0  }
 0x6a5   : > { %v1205_v25 = vsel %vm640_vm1, %v1203_v21, -inf  ;;  %v1206_v3 = vsel %vm640_vm1, %v1204_v23, -inf  ;;  %3477 = vmatprep.subr.mxu0 %v3777_v17  ;;  %3481 = vmatprep.mubr.msk.f32.mxu0 %vm3778_vm12, %v3777_v17 }
 0x6a6   : > { %v1207_v4 = vmax.f32 %v1205_v25, %v1206_v3  ;;  %v1643_v25 = vld [vmem:[%s4405_s8 + $0x10] sm:$0xff] }
 0x6a8   : > { %1208 = vmax.xlane.f32.xlu0 %v1207_v4 }
 0x731   : > { %v1209_v28 = vpop.xlane.xlu0 %1208 }
 0x732   : > { %v1210_v29 = vrot.slane %v1209_v28, 4 }
 0x734   : > { %v1211_v30 = vmax.f32 %v1209_v28, %v1210_v29 }
 0x736   : > { %v1212_v31 = vrot.slane %v1211_v30, 2 }
 0x738   : > { %v1213_v20 = vmax.f32 %v1211_v30, %v1212_v31 }
 0x73a   : > { %v1214_v32 = vrot.slane %v1213_v20, 1 }
 0x73c   : > { %v1215_v33 = vmax.f32 %v1213_v20, %v1214_v32 }
 0x73e   : > { %3617 = vpush %v1215_v33 }
 0x76f   : > { %s3618_s20 = spop %3617 }
 0x770   : > { %v1217_v34 = vstv %s3618_s20 }
 0x771   : > { %v1218_v35 = vsub.f32 %v1203_v21, %v1217_v34  ;;  %v1219_v36 = vsub.f32 %v1204_v23, %v1217_v34  ;;  %v1641_v21 = vld [vmem:[%s4405_s8] sm:$0xff]  ;;  %v1644_v23 = vld [vmem:[%s4405_s8 + $0x18] sm:$0xf] }
 0x773   : > { %v1220_v37 = vmul.f32 1.442695, %v1218_v35  ;;  %v1222_v38 = vmul.f32 1.442695, %v1219_v36  ;;  %v3779_v35 = vmov 1966171168  }
 0x774   : > { %v1545_v36 = vunpack.c.l.s4 %v3779_v35  ;;  %v1671_v35 = vld [vmem:[%s4405_s8 + $0xf0] sm:$0xff] }
 0x775   : > { %3685 = vpow2.f32 %v1220_v37 }
 0x776   : > { %3687 = vpow2.f32 %v1222_v38  ;;  %v1546_v38 = vunpack.c.0.s8 %v1545_v36 }
 0x782   : > { %v3686_v39 = vpop.eup %3685 }
 0x783   : > { %v3688_v40 = vpop.eup %3687  ;;  %v1224_v41 = vmul.f32 %v3686_v39, %v3971_v14  ;;  %v1226_v45 = vmul.f32 %v3686_v39, %v3981_v22  ;;  %v1228_v49 = vmul.f32 %v3686_v39, %v3990_v26 }
 0x784   : > { %v1225_v43 = vmul.f32 %v3688_v40, %v3975_v19  ;;  %v1227_v47 = vmul.f32 %v3688_v40, %v3986_v24  ;;  %v1229_v19 = vmul.f32 %v3688_v40, %v3994_v27 }
 0x785   : > { %v1230_v42 = vsel %vm640_vm1, %v1224_v41, 0.0  ;;  %v1236_v46 = vsel %vm640_vm1, %v1226_v45, 0.0  ;;  %v1242_v14 = vsel %vm640_vm1, %v1228_v49, 0.0 }
 0x786   : > { %1231 = vadd.xlane.f32.xlu0 %v1230_v42  ;;  %v1233_v44 = vsel %vm640_vm1, %v1225_v43, 0.0  ;;  %v1239_v48 = vsel %vm640_vm1, %v1227_v47, 0.0  ;;  %v1245_v50 = vsel %vm640_vm1, %v1229_v19, 0.0 }
 0x78a   : > { %1234 = vadd.xlane.f32.xlu0 %v1233_v44 }
 0x78e   : > { %1237 = vadd.xlane.f32.xlu0 %v1236_v46 }
 0x792   : > { %1240 = vadd.xlane.f32.xlu0 %v1239_v48 }
 0x796   : > { %1243 = vadd.xlane.f32.xlu0 %v1242_v14  ;;  %v1648_v14 = vld [vmem:[%s4405_s8 + $0x38] sm:$0xf] }
 0x79a   : > { %1246 = vadd.xlane.f32.xlu0 %v1245_v50  ;;  %v1647_v50 = vld [vmem:[%s4405_s8 + $0x30] sm:$0xff] }
 0x80f   : > { %v1232_v22 = vpop.xlane.xlu0 %1231 }
 0x810   : > { %v1248_v51 = vmax.f32 %v1232_v22, 1e-16  ;;  %v1650_v22 = vld [vmem:[%s4405_s8 + $0x48] sm:$0xf] }
 0x812   : > { %3689 = vrcp.f32 %v1248_v51 }
 0x813   : > { %v1235_v52 = vpop.xlane.xlu0 %1234 }
 0x814   : > { %v1249_v53 = vmax.f32 %v1235_v52, 1e-16 }
 0x816   : > { %3691 = vrcp.f32 %v1249_v53 }
 0x817   : > { %v1238_v24 = vpop.xlane.xlu0 %1237 }
 0x818   : > { %v1250_v54 = vmax.f32 %v1238_v24, 1e-16  ;;  %v1649_v24 = vld [vmem:[%s4405_s8 + $0x40] sm:$0xff] }
 0x81a   : > { %3693 = vrcp.f32 %v1250_v54  ;;  %v1652_v54 = vld [vmem:[%s4405_s8 + $0x58] sm:$0xf] }
 0x81b   : > { %v1241_v55 = vpop.xlane.xlu0 %1240 }
 0x81c   : > { %v1251_v26 = vmax.f32 %v1241_v55, 1e-16 }
 0x81e   : > { %3695 = vrcp.f32 %v1251_v26 }
 0x81f   : > { %v3690_v56 = vpop.eup %3689  ;;  %v1244_v59 = vpop.xlane.xlu0 %1243 }
 0x820   : > { %v1252_v60 = vmax.f32 %v1244_v59, 1e-16  ;;  %v1255_v27 = vmul.f32 %v3690_v56, %v1224_v41  ;;  %v4102_v41 = vsub.s32 %v1546_v38, %v3954_v18  ;;  %v1645_v18 = vld [vmem:[%s4405_s8 + $0x20] sm:$0xff]  ;;  %v1651_v59 = vld [vmem:[%s4405_s8 + $0x50] sm:$0xff] }
 0x821   : > { %v2917_v38 = vld [vmem:[%s4407_s10 + $0x10] sm:$0xf] }
 0x822   : > { %3697 = vrcp.f32 %v1252_v60  ;;  %3460 = vmatprep.mubr.msk.f32.mxu1 %vm640_vm1, %v1255_v27  ;;  %v1654_v60 = vld [vmem:[%s4405_s8 + $0x68] sm:$0xf] }
 0x823   : > { %v3692_v61 = vpop.eup %3691  ;;  %v1247_v62 = vpop.xlane.xlu0 %1246 }
 0x824   : > { %v1253_v63 = vmax.f32 %v1247_v62, 1e-16  ;;  %v1257_v0 = vmul.f32 %v3692_v61, %v1225_v43  ;;  %v1653_v61 = vld [vmem:[%s4405_s8 + $0x60] sm:$0xff]  ;;  %v1656_v62 = vld [vmem:[%s4405_s8 + $0x78] sm:$0xf] }
 0x826   : > { %3699 = vrcp.f32 %v1253_v63  ;;  %3461 = vmatmul.mubr.msk.f32.vlgmr.msra.gmra.mxu1 %vm640_vm1, %v1257_v0 }
 0x827   : > { %v3694_v1 = vpop.eup %3693  ;;  %3464 = vmatpush3.msra.mxu1 %v4018_v57 }
 0x828   : > { %3465 = vmatprep.subr.mxu1 %v4021_v58  ;;  %v1259_v2 = vmul.f32 %v3694_v1, %v1226_v45  ;;  %v1655_v1 = vld [vmem:[%s4405_s8 + $0x70] sm:$0xff] }
 0x829   : > { %3466 = vmatpush3.msra.mxu1 %v4021_v58 }
 0x82a   : > { %3470 = vmatprep.subr.mxu1 %v4018_v57  ;;  %3467 = vmatprep.mubr.msk.f32.mxu1 %vm640_vm1, %v1259_v2  ;;  %v1658_v2 = vld [vmem:[%s4405_s8 + $0x88] sm:$0xf] }
 0x82b   : > { %v3696_v5 = vpop.eup %3695 }
 0x82c   : > { %v1261_v6 = vmul.f32 %v3696_v5, %v1227_v47  ;;  %v1646_v47 = vld [vmem:[%s4405_s8 + $0x28] sm:$0xf] }
 0x82e   : > { %3468 = vmatmul.mubr.msk.f32.vlgmr.msra.gmra.mxu1 %vm640_vm1, %v1261_v6 }
 0x82f   : > { %v3698_v7 = vpop.eup %3697  ;;  %3471 = vmatpush3.msra.mxu1 %v4018_v57 }
 0x830   : > { %3472 = vmatprep.subr.mxu1 %v4021_v58  ;;  %v1263_v8 = vmul.f32 %v3698_v7, %v1228_v49  ;;  %v1657_v7 = vld [vmem:[%s4405_s8 + $0x80] sm:$0xff] }
 0x831   : > { %3473 = vmatpush3.msra.mxu1 %v4021_v58  ;;  %v1642_v58 = vld [vmem:[%s4405_s8 + $0x8] sm:$0xf] }
 0x832   : > { %3474 = vmatprep.mubr.msk.f32.mxu1 %vm640_vm1, %v1263_v8  ;;  %3484 = vmatprep.subr.mxu1 %v3777_v17  ;;  %v1660_v8 = vld [vmem:[%s4405_s8 + $0x98] sm:$0xf] }
 0x833   : > { %v3700_v9 = vpop.eup %3699  ;;  %3478 = vmatpush3.msk.msra.mxu0 %vm1676_vm11, %v1642_v58 }
 0x834   : > { %v1265_v10 = vmul.f32 %v3700_v9, %v1229_v19  ;;  %3479 = vmatprep.subr.mxu0 %v3777_v17 }
 0x835   : > { %3480 = vmatpush3.msra.mxu0 %v1641_v21  ;;  %v1663_v21 = vld [vmem:[%s4405_s8 + $0xb0] sm:$0xff] }
 0x836   : > { %3475 = vmatmul.mubr.msk.f32.vlgmr.msra.gmra.mxu1 %vm640_vm1, %v1265_v10  ;;  %3491 = vmatprep.subr.mxu0 %v3777_v17 }
 0x837   : > { %3485 = vmatpush3.msk.msra.mxu1 %vm1676_vm11, %v1644_v23  ;;  %3488 = vmatprep.mubr.msk.f32.mxu1 %vm3778_vm12, %v3777_v17  ;;  %v1666_v23 = vld [vmem:[%s4405_s8 + $0xc8] sm:$0xf] }
 0x838   : > { %3486 = vmatprep.subr.mxu1 %v3777_v17 }
 0x839   : > { %3487 = vmatpush3.msra.mxu1 %v1643_v25 }
 0x83a   : > { %3498 = vmatprep.subr.mxu1 %v3777_v17 }
 0x8e6   : > { %v3462_v11 = vpop.f32.mrf.mxu1 }
 0x8e8   : > { %v1338_v12 = vpop.f32.mrf.mxu1 }
 0x8ee   : > { %v3469_v13 = vpop.f32.mrf.mxu1 }
 0x8f0   : > { %v1419_v15 = vpop.f32.mrf.mxu1 }
 0x8f1   : > { %1511 = vrot.lane.b32.xlu0 %v1419_v15, %s3775_s23 }
 0x8f5   : > { %1513 = vrot.lane.b32.xlu0 %v3469_v13, %s3775_s23 }
 0x8f6   : > { %v3476_v16 = vpop.f32.mrf.mxu1 }
 0x8f8   : > { %v1500_v57 = vpop.f32.mrf.mxu1 }
 0x8f9   : > { %1521 = vrot.lane.b32.xlu0 %v3476_v16, %s3776_s19  ;;  %1519 = vrot.lane.b32.xlu1 %v1500_v57, %s3776_s19  ;;  %v1661_v16 = vld [vmem:[%s4405_s8 + $0xa0] sm:$0xff]  ;;  %v1664_v57 = vld [vmem:[%s4405_s8 + $0xb8] sm:$0xf]  ;;  %s3317_s19 = sshll.u32 %s3887_s25, 4  ;;  %s3780_s25 = smov [#allocation2]  }
 0x8fa   : > { %s4362_s18 = scalar_lea.hbm %s4413_s16, %s3317_s19  ;;  %s3715_s20 = sshll.u32 %s3780_s25, 4  ;;  %s3716_s20 = int_to_ptr.vmem [resolvable:$false] %s3715_s20 }
 0x8fb   : > { %s3717_s23 = scalar_lea.vmem %s3716_s20, 32  ;;  %p3718_p0 = scmp.lt.s32.totalorder %s3180_s28, %s3716_s20 }
 0x8fc   : > { %p3719_p1 = scmp.lt.s32.totalorder %s3717_s23, %s3711_s3 }
 0x8fe   : > { %p3720_p2 = por %p3719_p1, %p3718_p0 }
 0x900   : > { %p3721_p3 = pnand %p3720_p2, %p3714_p13 }
 0x963   : > { %v1512_v3 = vpop.permute.xlu0 %1511 }
 0x964   : > { %v1525_v4 = vsel %vm1140_vm8, %v1338_v12, %v1512_v3  ;;  %v1662_v12 = vld [vmem:[%s4405_s8 + $0xa8] sm:$0xf] }
 0x967   : > { %v1514_v28 = vpop.permute.xlu0 %1513 }
 0x968   : > { %v1526_v33 = vsel %vm1140_vm8, %v3462_v11, %v1514_v28  ;;  %v1659_v11 = vld [vmem:[%s4405_s8 + $0x90] sm:$0xff]  ;;  %v1668_v28 = vld [vmem:[%s4405_s8 + $0xd8] sm:$0xf] }
 0x96b   : > { %v1520_v29 = vpop.permute.xlu1 %1519  ;;  %v1522_v32 = vpop.permute.xlu0 %1521 }
 0x96c   : > { %v1527_v30 = vsel %vm550_vm0, %v1525_v4, %v1520_v29  ;;  %v4098_v34 = vsel %vm550_vm0, %v1526_v33, %v1522_v32  ;;  %v1665_v4 = vld [vmem:[%s4405_s8 + $0xc0] sm:$0xff]  ;;  %vm2875_vm0 = vcmask 155648  }
 0x96d   : > { %v1531_v31 = vmin.f32 %v1527_v30, 0.0  ;;  %v1532_v37 = vmin.f32 %v4098_v34, 0.0  ;;  %vm1529_vm13 = vcmp.gt.f32.partialorder %v1527_v30, 0.0  ;;  %vm1530_vm15 = vcmp.gt.f32.partialorder %v4098_v34, 0.0  ;;  %v1669_v33 = vld [vmem:[%s4405_s8 + $0xe0] sm:$0xff] }
 0x96f   : > { %v1533_v20 = vmul.f32 1.442695, %v1531_v31  ;;  %v1535_v39 = vmul.f32 1.442695, %v1532_v37  ;;  %v1667_v31 = vld [vmem:[%s4405_s8 + $0xd0] sm:$0xff] }
 0x971   : > { %3701 = vpow2.f32 %v1533_v20  ;;  %v1670_v20 = vld [vmem:[%s4405_s8 + $0xe8] sm:$0xf] }
 0x972   : > { %3703 = vpow2.f32 %v1535_v39  ;;  %v2916_v39 = vld [vmem:[%s4407_s10 + $0x8] sm:$0xff] }
 0x97e   : > { %v3702_v40 = vpop.eup %3701 }
 0x97f   : > { %v3275_v42 = vadd.f32 -1.0, %v3702_v40  ;;  %v3704_v52 = vpop.eup %3703  ;;  %v2915_v40 = vld [vmem:[%s4407_s10] sm:$0xff] }
 0x980   : > { %v3276_v56 = vadd.f32 -1.0, %v3704_v52 }
 0x981   : > { %v1539_v43 = vsel %vm1529_vm13, %v1527_v30, %v3275_v42 }
 0x982   : > { %v1550_v44 = vrot.slane %v1539_v43, %v4102_v41  ;;  %v1543_v48 = vcombine.high %v1539_v43, %v1539_v43  ;;  %v1540_v63 = vsel %vm1530_vm15, %v4098_v34, %v3276_v56  ;;  %v1672_v34 = vld [vmem:[%s4405_s8 + $0xf8] sm:$0xf] }
 0x983   : > { %v1599_v5 = vrot.slane %v1540_v63, %v4102_v41  ;;  %v1592_v13 = vcombine.high %v1540_v63, %v1540_v63 }
 0x984   : > { %v1558_v45 = vcombine.high %v1550_v44, %v1550_v44  ;;  %v1566_v46 = vrot.slane %v1550_v44, %v4102_v41  ;;  %v1557_v51 = vrot.slane %v1543_v48, %v4102_v41 }
 0x985   : > { %v1607_v9 = vcombine.high %v1599_v5, %v1599_v5  ;;  %v1615_v10 = vrot.slane %v1599_v5, %v4102_v41  ;;  %v1606_v25 = vrot.slane %v1592_v13, %v4102_v41 }
 0x986   : > { %v1580_v49 = vrot.slane %v1558_v45, %v4102_v41  ;;  %3482 = vmatmul.mubr.msk.f32.vlgmr.msra.gmra.mxu0 %vm1673_vm14, %v1566_v46  ;;  %v1588_v19 = vcombine.high %v1566_v46, %v1566_v46  ;;  %v1559_v55 = vcombine.high %v1557_v51, %v1557_v51  ;;  %v1573_v26 = vrot.slane %v1557_v51, %v4102_v41 }
 0x987   : > { %3492 = vmatpush3.msk.msra.mxu0 %vm1676_vm11, %v1646_v47  ;;  %3495 = vmatprep.mubr.msk.f32.mxu0 %vm3778_vm12, %v3777_v17  ;;  %v1629_v15 = vrot.slane %v1607_v9, %v4102_v41  ;;  %v1637_v58 = vcombine.high %v1615_v10, %v1615_v10  ;;  %v1608_v29 = vcombine.high %v1606_v25, %v1606_v25 }
 0x988   : > { %3493 = vmatprep.subr.mxu0 %v3777_v17  ;;  %3489 = vmatmul.mubr.msk.f32.vlgmr.msra.gmra.mxu1 %vm1673_vm14, %v1580_v49  ;;  %v1590_v53 = vcombine.high %v1580_v49, %v1580_v49  ;;  %v1587_v27 = vrot.slane %v1559_v55, %v4102_v41  ;;  %v1589_v0 = vcombine.high %v1573_v26, %v1573_v26 }
 0x989   : > { %3494 = vmatpush3.msra.mxu0 %v1645_v18  ;;  %3499 = vmatpush3.msk.msra.mxu1 %vm1676_vm11, %v1648_v14  ;;  %v1639_v3 = vcombine.high %v1629_v15, %v1629_v15  ;;  %v1622_v30 = vrot.slane %v1606_v25, %v4102_v41  ;;  %v1636_v32 = vrot.slane %v1608_v29, %v4102_v41 }
 0x98a   : > { %3500 = vmatprep.subr.mxu1 %v3777_v17  ;;  %3505 = vmatprep.subr.mxu0 %v3777_v17  ;;  %v1591_v6 = vcombine.high %v1587_v27, %v1587_v27 }
 0x98b   : > { %3496 = vmatmul.mubr.msk.f32.vlgmr.msra.gmra.mxu0 %vm1673_vm14, %v1588_v19  ;;  %3501 = vmatpush3.msra.mxu1 %v1647_v50  ;;  %v1638_v36 = vcombine.high %v1622_v30, %v1622_v30  ;;  %v1640_v37 = vcombine.high %v1636_v32, %v1636_v32 }
 0x98c   : > { %3506 = vmatpush3.msk.msra.mxu0 %vm1676_vm11, %v1650_v22  ;;  %3502 = vmatprep.mubr.msk.f32.mxu1 %vm3778_vm12, %v3777_v17 }
 0x98d   : > { %3507 = vmatprep.subr.mxu0 %v3777_v17  ;;  %3512 = vmatprep.subr.mxu1 %v3777_v17 }
 0x98e   : > { %3503 = vmatmul.mubr.msk.f32.vlgmr.msra.gmra.mxu1 %vm1673_vm14, %v1590_v53  ;;  %3508 = vmatpush3.msra.mxu0 %v1649_v24 }
 0x98f   : > { %3513 = vmatpush3.msk.msra.mxu1 %vm1676_vm11, %v1652_v54  ;;  %3509 = vmatprep.mubr.msk.f32.mxu0 %vm3778_vm12, %v3777_v17 }
 0x990   : > { %3514 = vmatprep.subr.mxu1 %v3777_v17  ;;  %3519 = vmatprep.subr.mxu0 %v3777_v17 }
 0x991   : > { %3510 = vmatmul.mubr.msk.f32.vlgmr.msra.gmra.mxu0 %vm1673_vm14, %v1573_v26  ;;  %3515 = vmatpush3.msra.mxu1 %v1651_v59 }
 0x992   : > { %3520 = vmatpush3.msk.msra.mxu0 %vm1676_vm11, %v1654_v60  ;;  %3516 = vmatprep.mubr.msk.f32.mxu1 %vm3778_vm12, %v3777_v17 }
 0x993   : > { %3521 = vmatprep.subr.mxu0 %v3777_v17  ;;  %3526 = vmatprep.subr.mxu1 %v3777_v17 }
 0x994   : > { %3517 = vmatmul.mubr.msk.f32.vlgmr.msra.gmra.mxu1 %vm1673_vm14, %v1587_v27  ;;  %3522 = vmatpush3.msra.mxu0 %v1653_v61 }
 0x995   : > { %3527 = vmatpush3.msk.msra.mxu1 %vm1676_vm11, %v1656_v62  ;;  %3523 = vmatprep.mubr.msk.f32.mxu0 %vm3778_vm12, %v3777_v17 }
 0x996   : > { %3528 = vmatprep.subr.mxu1 %v3777_v17  ;;  %3533 = vmatprep.subr.mxu0 %v3777_v17 }
 0x997   : > { %3524 = vmatmul.mubr.msk.f32.vlgmr.msra.gmra.mxu0 %vm1673_vm14, %v1589_v0  ;;  %3529 = vmatpush3.msra.mxu1 %v1655_v1 }
 0x998   : > { %3534 = vmatpush3.msk.msra.mxu0 %vm1676_vm11, %v1658_v2  ;;  %3530 = vmatprep.mubr.msk.f32.mxu1 %vm3778_vm12, %v3777_v17 }
 0x999   : > { %3535 = vmatprep.subr.mxu0 %v3777_v17  ;;  %3540 = vmatprep.subr.mxu1 %v3777_v17 }
 0x99a   : > { %3531 = vmatmul.mubr.msk.f32.vlgmr.msra.gmra.mxu1 %vm1673_vm14, %v1591_v6  ;;  %3536 = vmatpush3.msra.mxu0 %v1657_v7 }
 0x99b   : > { %3541 = vmatpush3.msk.msra.mxu1 %vm1676_vm11, %v1660_v8  ;;  %3537 = vmatprep.mubr.msk.f32.mxu0 %vm3778_vm12, %v3777_v17 }
 0x99c   : > { %3542 = vmatprep.subr.mxu1 %v3777_v17  ;;  %3547 = vmatprep.subr.mxu0 %v3777_v17 }
 0x99d   : > { %3538 = vmatmul.mubr.msk.f32.vlgmr.msra.gmra.mxu0 %vm1673_vm14, %v1615_v10  ;;  %3543 = vmatpush3.msra.mxu1 %v1659_v11 }
 0x99e   : > { %3548 = vmatpush3.msk.msra.mxu0 %vm1676_vm11, %v1662_v12  ;;  %3544 = vmatprep.mubr.msk.f32.mxu1 %vm3778_vm12, %v3777_v17 }
 0x99f   : > { %3549 = vmatprep.subr.mxu0 %v3777_v17  ;;  %3554 = vmatprep.subr.mxu1 %v3777_v17 }
 0x9a0   : > { %3545 = vmatmul.mubr.msk.f32.vlgmr.msra.gmra.mxu1 %vm1673_vm14, %v1629_v15  ;;  %3550 = vmatpush3.msra.mxu0 %v1661_v16 }
 0x9a1   : > { %3555 = vmatpush3.msk.msra.mxu1 %vm1676_vm11, %v1664_v57  ;;  %3551 = vmatprep.mubr.msk.f32.mxu0 %vm3778_vm12, %v3777_v17 }
 0x9a2   : > { %3556 = vmatprep.subr.mxu1 %v3777_v17  ;;  %3561 = vmatprep.subr.mxu0 %v3777_v17 }
 0x9a3   : > { %3552 = vmatmul.mubr.msk.f32.vlgmr.msra.gmra.mxu0 %vm1673_vm14, %v1637_v58  ;;  %3557 = vmatpush3.msra.mxu1 %v1663_v21 }
 0x9a4   : > { %3562 = vmatpush3.msk.msra.mxu0 %vm1676_vm11, %v1666_v23  ;;  %3558 = vmatprep.mubr.msk.f32.mxu1 %vm3778_vm12, %v3777_v17 }
 0x9a5   : > { %3563 = vmatprep.subr.mxu0 %v3777_v17  ;;  %3568 = vmatprep.subr.mxu1 %v3777_v17 }
 0x9a6   : > { %3559 = vmatmul.mubr.msk.f32.vlgmr.msra.gmra.mxu1 %vm1673_vm14, %v1639_v3  ;;  %3564 = vmatpush3.msra.mxu0 %v1665_v4 }
 0x9a7   : > { %3569 = vmatpush3.msk.msra.mxu1 %vm1676_vm11, %v1668_v28  ;;  %3565 = vmatprep.mubr.msk.f32.mxu0 %vm3778_vm12, %v3777_v17 }
 0x9a8   : > { %3570 = vmatprep.subr.mxu1 %v3777_v17  ;;  %3575 = vmatprep.subr.mxu0 %v3777_v17 }
 0x9a9   : > { %3566 = vmatmul.mubr.msk.f32.vlgmr.msra.gmra.mxu0 %vm1673_vm14, %v1622_v30  ;;  %3571 = vmatpush3.msra.mxu1 %v1667_v31 }
 0x9aa   : > { %3576 = vmatpush3.msk.msra.mxu0 %vm1676_vm11, %v1670_v20  ;;  %3572 = vmatprep.mubr.msk.f32.mxu1 %vm3778_vm12, %v3777_v17 }
 0x9ab   : > { %3577 = vmatprep.subr.mxu0 %v3777_v17  ;;  %3582 = vmatprep.subr.mxu1 %v3777_v17 }
 0x9ac   : > { %3573 = vmatmul.mubr.msk.f32.vlgmr.msra.gmra.mxu1 %vm1673_vm14, %v1636_v32  ;;  %3578 = vmatpush3.msra.mxu0 %v1669_v33 }
 0x9ad   : > { %3583 = vmatpush3.msk.msra.mxu1 %vm1676_vm11, %v1672_v34  ;;  %3579 = vmatprep.mubr.msk.f32.mxu0 %vm3778_vm12, %v3777_v17 }
 0x9ae   : > { %3584 = vmatprep.subr.mxu1 %v3777_v17  ;;  %3580 = vmatmul.mubr.msk.f32.vlgmr.msra.gmra.mxu0 %vm1673_vm14, %v1638_v36 }
 0x9af   : > { %3585 = vmatpush3.msra.mxu1 %v1671_v35  ;;  %3586 = vmatprep.mubr.msk.f32.mxu1 %vm3778_vm12, %v3777_v17 }
 0x9b0   : > { %3589 = vmatprep.subr.mxu0 %v3777_v17  ;;  %3587 = vmatmul.mubr.msk.f32.vlgmr.msra.gmra.mxu1 %vm1673_vm14, %v1640_v37 }
 0x9b1   : > { %3595 = vmatprep.mubr.msk.f32.mxu0 %vm3778_vm12, %v3777_v17  ;;  %3598 = vmatprep.subr.mxu1 %v3777_v17 }
 0x9b2   : > { %3602 = vmatprep.mubr.msk.f32.mxu1 %vm3778_vm12, %v3777_v17  ;;  %3590 = vmatpush3.msk.msra.mxu0 %vm1676_vm11, %v2917_v38 }
 0x9b3   : > { %3591 = vmatprep.subr.mxu0 %v3777_v17 }
 0x9b4   : > { %3592 = vmatpush3.msra.mxu0 %v2916_v39  ;;  %v2907_v39 = vld [vmem:[%s4406_s9] sm:$0x1] }
 0x9b5   : > { %3593 = vmatprep.subr.mxu0 %v3777_v17 }
 0x9b6   : > { %3594 = vmatpush3.msra.mxu0 %v2915_v40 }
 0x9b7   : > { %3605 = vmatprep.subr.mxu0 %v3777_v17 }
 0xa46   : > { %v1746_v41 = vpop.f32.mrf.mxu0 }
 0xa47   : > { %v2876_v44 = vsel %vm2875_vm0, %v1746_v41, 0.0 }
 0xa48   : > { %v3483_v42 = vpop.f32.mrf.mxu0  ;;  %v1821_v43 = vpop.f32.mrf.mxu1 }
 0xa49   : > { %v2877_v45 = vsel %vm2875_vm0, %v1821_v43, 0.0 }
 0xa4a   : > { %v2878_v46 = vadd.f32 %v2877_v45, %v2876_v44  ;;  %v3490_v47 = vpop.f32.mrf.mxu1 }
 0xa4b   : > { %v1896_v48 = vpop.f32.mrf.mxu0 }
 0xa4c   : > { %v2879_v49 = vsel %vm2875_vm0, %v1896_v48, 0.0  ;;  %v3003_v48 = vld [vmem:[%s4409_s12 + $0x8] sm:$0xff] }
 0xa4d   : > { %v2880_v18 = vadd.f32 %v2879_v49, %v2878_v46  ;;  %v3497_v14 = vpop.f32.mrf.mxu0  ;;  %3599 = vmatpush3.msra.mxu1 %v3003_v48  ;;  %v3002_v49 = vld [vmem:[%s4409_s12] sm:$0xff] }
 0xa4e   : > { %v1971_v19 = vpop.f32.mrf.mxu1  ;;  %3600 = vmatprep.subr.mxu1 %v3777_v17 }
 0xa4f   : > { %v2881_v50 = vsel %vm2875_vm0, %v1971_v19, 0.0  ;;  %3601 = vmatpush3.msra.mxu1 %v3002_v49 }
 0xa50   : > { %v2882_v22 = vadd.f32 %v2881_v50, %v2880_v18  ;;  %v3504_v51 = vpop.f32.mrf.mxu1  ;;  %v2918_v18 = vld [vmem:[%s4408_s11] sm:$0x1] }
 0xa51   : > { %v2046_v52 = vpop.f32.mrf.mxu0 }
 0xa52   : > { %v2883_v53 = vsel %vm2875_vm0, %v2046_v52, 0.0 }
 0xa53   : > { %v2884_v24 = vadd.f32 %v2883_v53, %v2882_v22  ;;  %v3511_v54 = vpop.f32.mrf.mxu0 }
 0xa54   : > { %v2121_v55 = vpop.f32.mrf.mxu1  ;;  %v3086_v54 = vld [vmem:[%s4411_s14 + $0x10] sm:$0xf] }
 0xa55   : > { %v2885_v26 = vsel %vm2875_vm0, %v2121_v55, 0.0  ;;  %v3085_v55 = vld [vmem:[%s4411_s14 + $0x8] sm:$0xff] }
 0xa56   : > { %v2886_v56 = vadd.f32 %v2885_v26, %v2884_v24  ;;  %v3518_v59 = vpop.f32.mrf.mxu1  ;;  %v3084_v26 = vld [vmem:[%s4411_s14] sm:$0xff] }
 0xa57   : > { %v2196_v60 = vpop.f32.mrf.mxu0 }
 0xa58   : > { %v2887_v27 = vsel %vm2875_vm0, %v2196_v60, 0.0 }
 0xa59   : > { %v2888_v61 = vadd.f32 %v2887_v27, %v2886_v56  ;;  %v3525_v62 = vpop.f32.mrf.mxu0  ;;  %v3004_v56 = vld [vmem:[%s4410_s13] sm:$0x1] }
 0xa5a   : > { %v2271_v63 = vpop.f32.mrf.mxu1 }
 0xa5b   : > { %v2889_v0 = vsel %vm2875_vm0, %v2271_v63, 0.0 }
 0xa5c   : > { %v2890_v1 = vadd.f32 %v2889_v0, %v2888_v61  ;;  %v3532_v2 = vpop.f32.mrf.mxu1 }
 0xa5d   : > { %v2346_v5 = vpop.f32.mrf.mxu0 }
 0xa5e   : > { %v2891_v6 = vsel %vm2875_vm0, %v2346_v5, 0.0 }
 0xa5f   : > { %v2892_v7 = vadd.f32 %v2891_v6, %v2890_v1  ;;  %v3539_v8 = vpop.f32.mrf.mxu0  ;;  %v3087_v1 = vld [vmem:[%s4412_s15] sm:$0x1] }
 0xa60   : > { %v2421_v9 = vpop.f32.mrf.mxu1 }
 0xa61   : > { %v2893_v10 = vsel %vm2875_vm0, %v2421_v9, 0.0 }
 0xa62   : > { %v2894_v11 = vadd.f32 %v2893_v10, %v2892_v7  ;;  %v3546_v12 = vpop.f32.mrf.mxu1 }
 0xa63   : > { %v2496_v13 = vpop.f32.mrf.mxu0 }
 0xa64   : > { %v2895_v15 = vsel %vm2875_vm0, %v2496_v13, 0.0 }
 0xa65   : > { %v2896_v16 = vadd.f32 %v2895_v15, %v2894_v11  ;;  %v3553_v57 = vpop.f32.mrf.mxu0 }
 0xa66   : > { %v2571_v58 = vpop.f32.mrf.mxu1 }
 0xa67   : > { %v2897_v21 = vsel %vm2875_vm0, %v2571_v58, 0.0 }
 0xa68   : > { %v2898_v23 = vadd.f32 %v2897_v21, %v2896_v16  ;;  %v3560_v25 = vpop.f32.mrf.mxu1 }
 0xa69   : > { %v2646_v3 = vpop.f32.mrf.mxu0 }
 0xa6a   : > { %v2899_v4 = vsel %vm2875_vm0, %v2646_v3, 0.0 }
 0xa6b   : > { %v2900_v28 = vadd.f32 %v2899_v4, %v2898_v23  ;;  %v3567_v29 = vpop.f32.mrf.mxu0 }
 0xa6c   : > { %v2721_v30 = vpop.f32.mrf.mxu1 }
 0xa6d   : > { %v2901_v31 = vsel %vm2875_vm0, %v2721_v30, 0.0 }
 0xa6e   : > { %v2902_v20 = vadd.f32 %v2901_v31, %v2900_v28  ;;  %v3574_v32 = vpop.f32.mrf.mxu1  ;;  %v2796_v33 = vpop.f32.mrf.mxu0 }
 0xa6f   : > { %v2903_v34 = vsel %vm2875_vm0, %v2796_v33, 0.0 }
 0xa70   : > { %v2904_v35 = vadd.f32 %v2903_v34, %v2902_v20  ;;  %v3581_v36 = vpop.f32.mrf.mxu0  ;;  %v2871_v37 = vpop.f32.mrf.mxu1 }
 0xa71   : > { %v2905_v38 = vsel %vm2875_vm0, %v2871_v37, 0.0 }
 0xa72   : > { %v2906_v40 = vadd.f32 %v2905_v38, %v2904_v35  ;;  %v3588_v41 = vpop.f32.mrf.mxu1 }
 0xa74   : > { %v2908_v42 = vadd.f32 %v2907_v39, %v2906_v40 }
 0xa76   : > { %v2910_v43 = vmin.f32 %v2908_v42, 0.0  ;;  %vm2909_vm3 = vcmp.gt.f32.partialorder %v2908_v42, 0.0 }
 0xa78   : > { %v2911_v44 = vmul.f32 1.442695, %v2910_v43 }
 0xa7a   : > { %3705 = vpow2.f32 %v2911_v44 }
 0xa87   : > { %v3706_v45 = vpop.eup %3705 }
 0xa88   : > { %v3309_v46 = vadd.f32 -1.0, %v3706_v45 }
 0xa8a   : > { %v2914_v47 = vsel %vm2909_vm3, %v2908_v42, %v3309_v46 }
 0xa8b   : > { %3596 = vmatmul.mubr.msk.f32.vlgmr.msra.gmra.mxu0 %vm2919_vm2, %v2914_v47 }
 0xa8c   : > { %3611 = vmatprep.mubr.msk.f32.mxu0 %vm3778_vm12, %v3777_v17  ;;  %3606 = vmatpush3.msk.msra.mxu0 %vm1676_vm11, %v3086_v54 }
 0xa8d   : > { %3607 = vmatprep.subr.mxu0 %v3777_v17 }
 0xa8e   : > { %3608 = vmatpush3.msra.mxu0 %v3085_v55 }
 0xa8f   : > { %3609 = vmatprep.subr.mxu0 %v3777_v17 }
 0xa90   : > { %3610 = vmatpush3.msra.mxu0 %v3084_v26 }
 0xb4b   : > { %v2992_v14 = vpop.f32.mrf.mxu0 }
 0xb4c   : > { %v2993_v19 = vadd.f32 %v2992_v14, %v2918_v18 }
 0xb4d   : > { %v3597_v50 = vpop.f32.mrf.mxu0 }
 0xb4e   : > { %v2997_v22 = vmin.f32 %v2993_v19, 0.0  ;;  %vm2996_vm4 = vcmp.gt.f32.partialorder %v2993_v19, 0.0 }
 0xb50   : > { %v2998_v51 = vmul.f32 1.442695, %v2997_v22 }
 0xb52   : > { %3707 = vpow2.f32 %v2998_v51 }
 0xb5f   : > { %v3708_v52 = vpop.eup %3707 }
 0xb60   : > { %v3312_v53 = vadd.f32 -1.0, %v3708_v52 }
 0xb62   : > { %v3001_v24 = vsel %vm2996_vm4, %v2993_v19, %v3312_v53 }
 0xb63   : > { %3603 = vmatmul.mubr.msk.f32.vlgmr.msra.gmra.mxu1 %vm640_vm1, %v3001_v24 }
 0xc23   : > { %v3074_v59 = vpop.f32.mrf.mxu1 }
 0xc24   : > { %v3075_v60 = vadd.f32 %v3074_v59, %v3004_v56 }
 0xc25   : > { %v3604_v27 = vpop.f32.mrf.mxu1 }
 0xc26   : > { %v3079_v61 = vmin.f32 %v3075_v60, 0.0  ;;  %vm3078_vm1 = vcmp.gt.f32.partialorder %v3075_v60, 0.0 }
 0xc28   : > { %v3080_v62 = vmul.f32 1.442695, %v3079_v61 }
 0xc2a   : > { %3709 = vpow2.f32 %v3080_v62 }
 0xc37   : > { %v3710_v63 = vpop.eup %3709 }
 0xc38   : > { %v3314_v0 = vadd.f32 -1.0, %v3710_v63 }
 0xc3a   : > { %v3083_v17 = vsel %vm3078_vm1, %v3075_v60, %v3314_v0 }
 0xc3b   : > { %3612 = vmatmul.mubr.msk.f32.vlgmr.msra.gmra.mxu0 %vm2919_vm2, %v3083_v17 }
 0xcfb   : > { %v3160_v2 = vpop.f32.mrf.mxu0 }
 0xcfc   : > { %v3161_v5 = vadd.f32 %v3160_v2, %v3087_v1 }
 0xcfd   : > { %v3613_v6 = vpop.f32.mrf.mxu0 }
 0xcfe   : > { %3165 = vst.msk [vmem:[%s528_s26] sm:$0x1] %vm3164_vm5, %v3161_v5 }
 0xcff   : > { %3724 = shalt.err (!%p3721_p3)
}
 0xd00   : > { %s3725_s19 = scalar_lea.hbm %s4362_s18, 16  ;;  %s3729_s1 = scalar_lea.hbm %s4413_s16, 32 }
 0xd01   : > { %p3726_p4 = scmp.ne.s32.totalorder %s4362_s18, %s3725_s19  ;;  %p3730_p9 = scmp.lt.s32.totalorder %s4362_s18, %s4413_s16 }
 0xd02   : > { %p3731_p10 = scmp.lt.s32.totalorder %s3729_s1, %s3725_s19 }
 0xd03   : > { %p3727_p7 = pnand %p3726_p4, %p3904_p5 }
 0xd04   : > { %p3732_p11 = por %p3731_p10, %p3730_p9 }
 0xd05   : > { %p3728_p8 = pneg %p3727_p7 }
 0xd07   : > { %p3733_p12 = pnand %p3732_p11, %p3728_p8 }
 0xd09   : > { %3736 = shalt.err (!%p3733_p12)
}
 0xd0a   : > { %3619 = dma.vmem_to_hbm [thread:$0]  (%p3904_p5), %s3180_s28, 16, %s4362_s18, %s3167_s2  }
 0xd0b PF: > { %p3625_p13 = scmp.ge.s32.totalorder %s3771_s24, 2  ;;  %s3191_s3 = sand.u32 1, %s3759_s21  }
 0xd0c   : > { %s3192_s20 = scalar_lea.sflag [#allocation3], %s3191_s3 }
 0xd0d   : > { %p3622_p0 = pnand %p3625_p13, %p3908_p6 }
 0xd0f   : > { %p3623_p1 = pneg %p3622_p0 }
 0xd11   : > { %3754 = dma.done.wait (%p3623_p1), %s3192_s20, 16  }
 0xd12   : > { %3756 = vsyncadd (%p3623_p1), %s3192_s20, 4294967280  ;;  %s4427_s23 = sld [smem:[#allocation5_spill]]  ;;  %p26_p2 = scmp.ge.s32.totalorder %s3891_s27, 4  }
 0xd13   : > { %s4428_s19 = sld [smem:[#allocation6_spill]]  ;;  %s4429_s21 = smov %s3763_s22 }
 0xd14   : > { %s4432_s24 = smov %s3891_s27 }
 0xd15   :  { %28 = sbr.rel (!%p26_p2) target bundleno = 8 (0x8), region = 122 }
 0xd18   : > { %s4430_s22 = smov %s4427_s23 }
 0xd19   : > { %s4431_s23 = smov %s4428_s19 }
 0xd1a   :  { %3196 = vsyncpa [#allocation3], 1 }
 0xd1b   :  { %3198 = vsyncpa [#allocation3 + $0x1], 1 }

</bundles_post_ra>
